<compile_context>
chip_gen: v7x
topology: tpu7x:2x2x1
jax: 0.10.0
libtpu: 0.0.40
codegen_flags: <defaults>
</compile_context>

<pallas_src>
import jax
import jax.numpy as jnp
import numpy as np
from jax import lax
from jax.experimental import pallas as pl
from jax.experimental.pallas import tpu as pltpu

EPS = 1e-5


# ----------------------------- fused Pallas kernel --------------------------

def _make_decoder_kernel(stage_meta):
    """Build the fused decoder kernel.

    stage_meta: tuple of (has_skip: bool, act: str) per stage (static).

    Ref order: x, shift_ops, then per stage [w_taps, bias, (skip)], then out.
      x        : (Cin0, Mb)      channel-major, row-major-flattened spatial
      shift_ops: (4, Mb, Mb)     [col+1, col-1, row+1, row-1] 0/1 shift+mask
      w_taps   : (9, Cout, Cin)  BN-folded tap weights, t = ky*3 + kx
      bias     : (Cout, 1)       BN-folded bias
      skip     : (Cout, Mb)      skip connection, pre-scaled by the BN scale
      out      : (Cout_last, Mb)
    """

    def kernel(*refs):
        x_ref, s_ref = refs[0], refs[1]
        ridx = 2
        cur = x_ref[...]                              # (Cin, Mb) float32

        for has_skip, act in stage_meta:
            w_ref, b_ref = refs[ridx], refs[ridx + 1]
            ridx += 2
            skip_ref = None
            if has_skip:
                skip_ref = refs[ridx]
                ridx += 1

            cout = w_ref.shape[1]
            mb = cur.shape[1]

            # dx-shifted (and W-edge-masked) copies of the stage input.
            col = [
                jnp.dot(cur, s_ref[1], preferred_element_type=jnp.float32),  # dx=-1
                cur,                                                         # dx= 0
                jnp.dot(cur, s_ref[0], preferred_element_type=jnp.float32),  # dx=+1
            ]

            acc = jnp.zeros((cout, mb), jnp.float32)
            for ky in range(3):                       # dy = ky - 1
                g = jnp.zeros((cout, mb), jnp.float32)
                for kx in range(3):                   # dx = kx - 1
                    g = g + jnp.dot(w_ref[ky * 3 + kx], col[kx],
                                    preferred_element_type=jnp.float32)
                if ky == 0:                           # dy = -1
                    g = jnp.dot(g, s_ref[3], preferred_element_type=jnp.float32)
                elif ky == 2:                         # dy = +1
                    g = jnp.dot(g, s_ref[2], preferred_element_type=jnp.float32)
                acc = acc + g

            acc = acc + b_ref[...]                    # folded BN bias
            if skip_ref is not None:
                acc = acc + skip_ref[...]             # skip added before BN (pre-scaled)
            if act == "relu":
                acc = jnp.maximum(acc, 0.0)
            else:                                     # sigmoid
                acc = 1.0 / (1.0 + jnp.exp(-acc))
            cur = acc

        refs[ridx][...] = cur                         # lane-dense (Cout, Mb) store

    return kernel


def _shift_operators(hg, wg, images_per_block):
    """Constant 0/1 operators realising +/-1 column / row shifts with edge
    masking on a flat row-major (hg x wg) grid; block-diagonal over the images
    that share one grid block."""
    mi = hg * wg

    def col(d):
        s = np.zeros((mi, mi), np.float32)
        for i in range(hg):
            for j in range(wg):
                if 0 <= j + d < wg:
                    s[i * wg + j + d, i * wg + j] = 1.0
        return s

    def row(d):
        s = np.zeros((mi, mi), np.float32)
        for i in range(hg):
            for j in range(wg):
                if 0 <= i + d < hg:
                    s[(i + d) * wg + j, i * wg + j] = 1.0
        return s

    mats = np.stack([col(+1), col(-1), row(+1), row(-1)])        # (4, mi, mi)
    if images_per_block > 1:
        eye = np.eye(images_per_block, dtype=np.float32)
        mats = np.stack([np.kron(eye, m) for m in mats])
    return mats


# --------------------------- parameter building ----------------------------

def _init_conv_t(key, cin, cout):
    k1, k2 = jax.random.split(key)
    w = 0.1 * jax.random.normal(k1, (cin, cout, 3, 3), jnp.float32)
    b = 0.1 * jax.random.normal(k2, (cout,), jnp.float32)
    return w, b


def _init_bn(key, c):
    k1, k2, k3, k4 = jax.random.split(key, 4)
    gamma = 1.0 + 0.1 * jax.random.normal(k1, (c,), jnp.float32)
    beta = 0.1 * jax.random.normal(k2, (c,), jnp.float32)
    mean = 0.1 * jax.random.normal(k3, (c,), jnp.float32)
    var = jax.random.uniform(k4, (c,), jnp.float32, 0.5, 1.5)
    return dict(gamma=gamma, beta=beta, mean=mean, var=var)


def build_decoder_params(key, output_channels, num_layers, stride_interval,
                         cdecrease_interval, base_channel, remain):
    """Mirrors Decoder.__init__ to decide per-layer (in_ch, out_ch, stride)."""
    layers = []
    in_ch = base_channel
    out_ch = base_channel
    cont_cinterval = remain - 1
    cont_sinterval = 0
    for _ in range(num_layers - 1):
        if cont_cinterval == 0:
            out_ch = out_ch // 2
            cont_cinterval = cdecrease_interval
        cont_cinterval -= 1
        if cont_sinterval == 0:
            stride = 2
            cont_sinterval = stride_interval
        else:
            stride = 1
        cont_sinterval -= 1
        key, k1, k2 = jax.random.split(key, 3)
        w, b = _init_conv_t(k1, in_ch, out_ch)
        bn = _init_bn(k2, out_ch)
        layers.append(dict(stride=stride, w=w, b=b, bn=bn,
                           in_ch=in_ch, out_ch=out_ch))
        in_ch = out_ch
    key, k1, k2 = jax.random.split(key, 3)
    w, b = _init_conv_t(k1, in_ch, output_channels)
    bn = _init_bn(k2, output_channels)
    final = dict(stride=1, w=w, b=b, bn=bn, in_ch=in_ch, out_ch=output_channels)
    return layers, final


# ----------------------------- Decoder forward -----------------------------

def decoder_forward(x_nchw, skip_conns_nchw, layers, final, stride_interval):
    n, cin0, h, w_in = x_nchw.shape

    # Mirror the PyTorch forward's skip bookkeeping -> static stage configs.
    stage_cfgs = []
    total_skips = len(skip_conns_nchw)
    cont = 0
    for lyr in layers:
        skip_idx = None
        if (cont + 1) % stride_interval == 0 and cont != 0:
            skip_idx = total_skips - 1
            total_skips -= 1
        stage_cfgs.append(dict(w=lyr["w"], b=lyr["b"], bn=lyr["bn"],
                               stride=lyr["stride"], skip_idx=skip_idx,
                               act="relu"))
        cont += 1
    stage_cfgs.append(dict(w=final["w"], b=final["b"], bn=final["bn"],
                           stride=final["stride"], skip_idx=0, act="sigmoid"))

    # Only the first stage may upsample; its zero-dilation (a few KB) is done
    # here so every stage inside the kernel is a stride-1 3x3 conv on the same
    # H_out x W_out grid.
    # TODO(synk): in-kernel sub-pixel decomposition for stride-2 stages beyond
    # the first one (not needed for this architecture).
    assert all(c["stride"] == 1 for c in stage_cfgs[1:]), (
        "fused kernel supports stride-2 only on the first stage")
    s0 = stage_cfgs[0]["stride"]
    hg, wg = h * s0, w_in * s0
    mi = hg * wg

    x_c = jnp.transpose(x_nchw, (1, 0, 2, 3)).astype(jnp.float32)  # (C, N, H, W)
    if s0 == 2:
        d4 = jnp.zeros((cin0, n, hg, wg), jnp.float32)
        d4 = d4.at[:, :, ::2, ::2].set(x_c)          # zero-dilated input grid
    else:
        d4 = x_c
    d_flat = d4.reshape(cin0, n * mi)

    # One grid step per image when the per-image flat size is lane-aligned
    # (both v7x TensorCores get work); otherwise one full block.
    ipb = 1 if mi % 128 == 0 else n                  # images per grid block
    n_blocks = n // ipb
    mb = ipb * mi
    shift_ops = jnp.asarray(_shift_operators(hg, wg, ipb))   # (4, mb, mb)

    inputs = [d_flat, shift_ops]
    in_specs = [
        pl.BlockSpec((cin0, mb), lambda i: (0, i)),
        pl.BlockSpec((4, mb, mb), lambda i: (0, 0, 0)),
    ]
    stage_meta = []
    for cfg in stage_cfgs:
        gamma, beta = cfg["bn"]["gamma"], cfg["bn"]["beta"]
        mean, var = cfg["bn"]["mean"], cfg["bn"]["var"]
        scale = gamma / jnp.sqrt(var + EPS)
        shift = beta - mean * scale
        cin, cout = cfg["w"].shape[0], cfg["w"].shape[1]

        # tap t = ky*3+kx reads offset (ky-1, kx-1) and uses the flipped
        # ConvTranspose weight w[ci, co, 2-ky, 2-kx]; BN scale folded in.
        wf = jnp.flip(cfg["w"], axis=(2, 3))
        w_taps = jnp.transpose(wf, (2, 3, 1, 0)).reshape(9, cout, cin)
        w_taps = (w_taps * scale[None, :, None]).astype(jnp.float32)
        bias = (scale * cfg["b"] + shift).reshape(cout, 1).astype(jnp.float32)

        inputs += [w_taps, bias]
        in_specs += [pl.BlockSpec((9, cout, cin), lambda i: (0, 0, 0)),
                     pl.BlockSpec((cout, 1), lambda i: (0, 0))]

        has_skip = cfg["skip_idx"] is not None
        if has_skip:
            sk = skip_conns_nchw[cfg["skip_idx"]]
            sk_cm = jnp.transpose(sk, (1, 0, 2, 3)).astype(jnp.float32)
            sk_cm = sk_cm.reshape(cout, n * mi)
            inputs.append(scale[:, None] * sk_cm)    # skip is added before BN
            in_specs.append(pl.BlockSpec((cout, mb), lambda i: (0, i)))
        stage_meta.append((has_skip, cfg["act"]))

    cout_last = stage_cfgs[-1]["w"].shape[1]
    out = pl.pallas_call(
        _make_decoder_kernel(tuple(stage_meta)),
        out_shape=jax.ShapeDtypeStruct((cout_last, n * mi), jnp.float32),
        grid=(n_blocks,),
        in_specs=in_specs,
        out_specs=pl.BlockSpec((cout_last, mb), lambda i: (0, i)),
        compiler_params=pltpu.CompilerParams(
            dimension_semantics=("parallel",)),
    )(*inputs)

    # (C, N, H, W) -> NCHW
    return jnp.transpose(out.reshape(cout_last, n, hg, wg), (1, 0, 2, 3))


# ------------------------- pure-JAX reference check ------------------------

def _conv_transpose_ref(x_nchw, w, b, stride):
    w_conv = jnp.transpose(jnp.flip(w, axis=(2, 3)), (1, 0, 2, 3))  # OIHW
    pad = (1, 1 + (stride - 1))
    y = lax.conv_general_dilated(
        x_nchw, w_conv, window_strides=(1, 1), padding=[pad, pad],
        lhs_dilation=(stride, stride), rhs_dilation=(1, 1),
        dimension_numbers=("NCHW", "OIHW", "NCHW"))
    return y + b[None, :, None, None]


def _bn_ref(x, bn):
    g, bta, m, v = bn["gamma"], bn["beta"], bn["mean"], bn["var"]
    return ((x - m[None, :, None, None]) / jnp.sqrt(v[None, :, None, None] + EPS)
            * g[None, :, None, None] + bta[None, :, None, None])


def decoder_forward_ref(x_nchw, skips, layers, final, stride_interval):
    x = x_nchw.astype(jnp.float32)
    total_skips = len(skips)
    cont = 0
    for lyr in layers:
        x = _conv_transpose_ref(x, lyr["w"], lyr["b"], lyr["stride"])
        if (cont + 1) % stride_interval == 0 and cont != 0:
            x = x + skips[total_skips - 1]
            total_skips -= 1
        x = jnp.maximum(_bn_ref(x, lyr["bn"]), 0.0)
        cont += 1
    x = _conv_transpose_ref(x, final["w"], final["b"], final["stride"]) + skips[0]
    x = jax.nn.sigmoid(_bn_ref(x, final["bn"]))
    return x


# ----------------------------------- main -----------------------------------

if __name__ == "__main__":
    # Decoder(output_channels=4, num_layers=3, stride_interval=2,
    #         cdecrease_interval=2, base_channel=8, remain=2, debug=False)
    output_channels, num_layers, stride_interval = 4, 3, 2
    cdecrease_interval, base_channel, remain = 2, 8, 2

    key = jax.random.PRNGKey(0)
    kparam, kx, ks0, ks1 = jax.random.split(key, 4)
    layers, final = build_decoder_params(
        kparam, output_channels, num_layers, stride_interval,
        cdecrease_interval, base_channel, remain)

    N, H, W = 2, 8, 8
    x = jax.random.normal(kx, (N, base_channel, H, W), jnp.float32)
    # skip_conns[1] is added after the 2nd deconv (shape (N,4,16,16));
    # skip_conns[0] is added after the final deconv (shape (N,4,16,16)).
    skip_conns = [
        jax.random.normal(ks0, (N, output_channels, 2 * H, 2 * W), jnp.float32),
        jax.random.normal(ks1, (N, layers[-1]["out_ch"], 2 * H, 2 * W), jnp.float32),
    ]

    out = decoder_forward(x, skip_conns, layers, final, stride_interval)
    out = jax.block_until_ready(out)

    ref = decoder_forward_ref(x, skip_conns, layers, final, stride_interval)
    ref = jax.block_until_ready(ref)

    assert out.shape == (N, output_channels, 2 * H, 2 * W), out.shape
    np.testing.assert_allclose(np.asarray(out), np.asarray(ref),
                               atol=1e-4, rtol=1e-4)
    print("KERNEL_OK")
</pallas_src>

<mosaic_0001>
module attributes {stable_mosaic.version = 11 : i64} {
  func.func @kernel(%arg0: i32, %arg1: memref<8x256xf32, #tpu.memory_space<vmem>>, %arg2: memref<4x256x256xf32, #tpu.memory_space<vmem>>, %arg3: memref<9x8x8xf32, #tpu.memory_space<vmem>>, %arg4: memref<8x1xf32, #tpu.memory_space<vmem>>, %arg5: memref<9x4x8xf32, #tpu.memory_space<vmem>>, %arg6: memref<4x1xf32, #tpu.memory_space<vmem>>, %arg7: memref<4x256xf32, #tpu.memory_space<vmem>>, %arg8: memref<9x4x4xf32, #tpu.memory_space<vmem>>, %arg9: memref<4x1xf32, #tpu.memory_space<vmem>>, %arg10: memref<4x256xf32, #tpu.memory_space<vmem>>, %arg11: memref<4x256xf32, #tpu.memory_space<vmem>>) attributes {dimension_semantics = [#tpu.dimension_semantics<parallel>], iteration_bounds = array<i64: 2>, scalar_prefetch = 0 : i64, scratch_operands = 0 : i64, tpu.core_type = #tpu.core_type<tc>, window_params = [{transform_indices = @transform_0, window_bounds = array<i64: 8, 256>}, {pipeline_mode = #tpu.pipeline_mode<synchronous>, transform_indices = @transform_1, window_bounds = array<i64: 4, 256, 256>}, {pipeline_mode = #tpu.pipeline_mode<synchronous>, transform_indices = @transform_2, window_bounds = array<i64: 9, 8, 8>}, {pipeline_mode = #tpu.pipeline_mode<synchronous>, transform_indices = @transform_3, window_bounds = array<i64: 8, 1>}, {pipeline_mode = #tpu.pipeline_mode<synchronous>, transform_indices = @transform_4, window_bounds = array<i64: 9, 4, 8>}, {pipeline_mode = #tpu.pipeline_mode<synchronous>, transform_indices = @transform_5, window_bounds = array<i64: 4, 1>}, {transform_indices = @transform_6, window_bounds = array<i64: 4, 256>}, {pipeline_mode = #tpu.pipeline_mode<synchronous>, transform_indices = @transform_7, window_bounds = array<i64: 9, 4, 4>}, {pipeline_mode = #tpu.pipeline_mode<synchronous>, transform_indices = @transform_8, window_bounds = array<i64: 4, 1>}, {transform_indices = @transform_9, window_bounds = array<i64: 4, 256>}, {transform_indices = @transform_10, window_bounds = array<i64: 4, 256>}]} {
    %c0 = arith.constant 0 : index
    %c0_0 = arith.constant 0 : index
    %0 = vector.load %arg1[%c0, %c0_0] : memref<8x256xf32, #tpu.memory_space<vmem>>, vector<8x256xf32>
    %c1 = arith.constant 1 : index
    %c0_1 = arith.constant 0 : index
    %c0_2 = arith.constant 0 : index
    %1 = vector.load %arg2[%c1, %c0_1, %c0_2] : memref<4x256x256xf32, #tpu.memory_space<vmem>>, vector<1x256x256xf32>
    %2 = vector.shape_cast %1 : vector<1x256x256xf32> to vector<256x256xf32>
    %cst = arith.constant dense<0.000000e+00> : vector<8x256xf32>
    %3 = tpu.matmul %0, %2, %cst {dimension_numbers = #tpu.dot_dimension_numbers<[1], [0], [0], [1], [0, 0, 1, 1], [], []>} : vector<8x256xf32>, vector<256x256xf32>, vector<8x256xf32> -> vector<8x256xf32>
    %c0_3 = arith.constant 0 : index
    %c0_4 = arith.constant 0 : index
    %c0_5 = arith.constant 0 : index
    %4 = vector.load %arg2[%c0_3, %c0_4, %c0_5] : memref<4x256x256xf32, #tpu.memory_space<vmem>>, vector<1x256x256xf32>
    %5 = vector.shape_cast %4 : vector<1x256x256xf32> to vector<256x256xf32>
    %cst_6 = arith.constant dense<0.000000e+00> : vector<8x256xf32>
    %6 = tpu.matmul %0, %5, %cst_6 {dimension_numbers = #tpu.dot_dimension_numbers<[1], [0], [0], [1], [0, 0, 1, 1], [], []>} : vector<8x256xf32>, vector<256x256xf32>, vector<8x256xf32> -> vector<8x256xf32>
    %cst_7 = arith.constant 0.000000e+00 : f32
    %7 = vector.broadcast %cst_7 : f32 to vector<8x256xf32>
    %cst_8 = arith.constant 0.000000e+00 : f32
    %8 = vector.broadcast %cst_8 : f32 to vector<8x256xf32>
    %c0_9 = arith.constant 0 : index
    %c0_10 = arith.constant 0 : index
    %c0_11 = arith.constant 0 : index
    %9 = vector.load %arg3[%c0_9, %c0_10, %c0_11] : memref<9x8x8xf32, #tpu.memory_space<vmem>>, vector<1x8x8xf32>
    %10 = vector.shape_cast %9 : vector<1x8x8xf32> to vector<8x8xf32>
    %cst_12 = arith.constant dense<0.000000e+00> : vector<8x256xf32>
    %11 = tpu.matmul %10, %3, %cst_12 {dimension_numbers = #tpu.dot_dimension_numbers<[1], [0], [0], [1], [0, 0, 1, 1], [], []>} : vector<8x8xf32>, vector<8x256xf32>, vector<8x256xf32> -> vector<8x256xf32>
    %12 = arith.addf %8, %11 : vector<8x256xf32>
    %c1_13 = arith.constant 1 : index
    %c0_14 = arith.constant 0 : index
    %c0_15 = arith.constant 0 : index
    %13 = vector.load %arg3[%c1_13, %c0_14, %c0_15] : memref<9x8x8xf32, #tpu.memory_space<vmem>>, vector<1x8x8xf32>
    %14 = vector.shape_cast %13 : vector<1x8x8xf32> to vector<8x8xf32>
    %cst_16 = arith.constant dense<0.000000e+00> : vector<8x256xf32>
    %15 = tpu.matmul %14, %0, %cst_16 {dimension_numbers = #tpu.dot_dimension_numbers<[1], [0], [0], [1], [0, 0, 1, 1], [], []>} : vector<8x8xf32>, vector<8x256xf32>, vector<8x256xf32> -> vector<8x256xf32>
    %16 = arith.addf %12, %15 : vector<8x256xf32>
    %c2 = arith.constant 2 : index
    %c0_17 = arith.constant 0 : index
    %c0_18 = arith.constant 0 : index
    %17 = vector.load %arg3[%c2, %c0_17, %c0_18] : memref<9x8x8xf32, #tpu.memory_space<vmem>>, vector<1x8x8xf32>
    %18 = vector.shape_cast %17 : vector<1x8x8xf32> to vector<8x8xf32>
    %cst_19 = arith.constant dense<0.000000e+00> : vector<8x256xf32>
    %19 = tpu.matmul %18, %6, %cst_19 {dimension_numbers = #tpu.dot_dimension_numbers<[1], [0], [0], [1], [0, 0, 1, 1], [], []>} : vector<8x8xf32>, vector<8x256xf32>, vector<8x256xf32> -> vector<8x256xf32>
    %20 = arith.addf %16, %19 : vector<8x256xf32>
    %c3 = arith.constant 3 : index
    %c0_20 = arith.constant 0 : index
    %c0_21 = arith.constant 0 : index
    %21 = vector.load %arg2[%c3, %c0_20, %c0_21] : memref<4x256x256xf32, #tpu.memory_space<vmem>>, vector<1x256x256xf32>
    %22 = vector.shape_cast %21 : vector<1x256x256xf32> to vector<256x256xf32>
    %cst_22 = arith.constant dense<0.000000e+00> : vector<8x256xf32>
    %23 = tpu.matmul %20, %22, %cst_22 {dimension_numbers = #tpu.dot_dimension_numbers<[1], [0], [0], [1], [0, 0, 1, 1], [], []>} : vector<8x256xf32>, vector<256x256xf32>, vector<8x256xf32> -> vector<8x256xf32>
    %24 = arith.addf %7, %23 : vector<8x256xf32>
    %cst_23 = arith.constant 0.000000e+00 : f32
    %25 = vector.broadcast %cst_23 : f32 to vector<8x256xf32>
    %c3_24 = arith.constant 3 : index
    %c0_25 = arith.constant 0 : index
    %c0_26 = arith.constant 0 : index
    %26 = vector.load %arg3[%c3_24, %c0_25, %c0_26] : memref<9x8x8xf32, #tpu.memory_space<vmem>>, vector<1x8x8xf32>
    %27 = vector.shape_cast %26 : vector<1x8x8xf32> to vector<8x8xf32>
    %cst_27 = arith.constant dense<0.000000e+00> : vector<8x256xf32>
    %28 = tpu.matmul %27, %3, %cst_27 {dimension_numbers = #tpu.dot_dimension_numbers<[1], [0], [0], [1], [0, 0, 1, 1], [], []>} : vector<8x8xf32>, vector<8x256xf32>, vector<8x256xf32> -> vector<8x256xf32>
    %29 = arith.addf %25, %28 : vector<8x256xf32>
    %c4 = arith.constant 4 : index
    %c0_28 = arith.constant 0 : index
    %c0_29 = arith.constant 0 : index
    %30 = vector.load %arg3[%c4, %c0_28, %c0_29] : memref<9x8x8xf32, #tpu.memory_space<vmem>>, vector<1x8x8xf32>
    %31 = vector.shape_cast %30 : vector<1x8x8xf32> to vector<8x8xf32>
    %cst_30 = arith.constant dense<0.000000e+00> : vector<8x256xf32>
    %32 = tpu.matmul %31, %0, %cst_30 {dimension_numbers = #tpu.dot_dimension_numbers<[1], [0], [0], [1], [0, 0, 1, 1], [], []>} : vector<8x8xf32>, vector<8x256xf32>, vector<8x256xf32> -> vector<8x256xf32>
    %33 = arith.addf %29, %32 : vector<8x256xf32>
    %c5 = arith.constant 5 : index
    %c0_31 = arith.constant 0 : index
    %c0_32 = arith.constant 0 : index
    %34 = vector.load %arg3[%c5, %c0_31, %c0_32] : memref<9x8x8xf32, #tpu.memory_space<vmem>>, vector<1x8x8xf32>
    %35 = vector.shape_cast %34 : vector<1x8x8xf32> to vector<8x8xf32>
    %cst_33 = arith.constant dense<0.000000e+00> : vector<8x256xf32>
    %36 = tpu.matmul %35, %6, %cst_33 {dimension_numbers = #tpu.dot_dimension_numbers<[1], [0], [0], [1], [0, 0, 1, 1], [], []>} : vector<8x8xf32>, vector<8x256xf32>, vector<8x256xf32> -> vector<8x256xf32>
    %37 = arith.addf %33, %36 : vector<8x256xf32>
    %38 = arith.addf %24, %37 : vector<8x256xf32>
    %cst_34 = arith.constant 0.000000e+00 : f32
    %39 = vector.broadcast %cst_34 : f32 to vector<8x256xf32>
    %c6 = arith.constant 6 : index
    %c0_35 = arith.constant 0 : index
    %c0_36 = arith.constant 0 : index
    %40 = vector.load %arg3[%c6, %c0_35, %c0_36] : memref<9x8x8xf32, #tpu.memory_space<vmem>>, vector<1x8x8xf32>
    %41 = vector.shape_cast %40 : vector<1x8x8xf32> to vector<8x8xf32>
    %cst_37 = arith.constant dense<0.000000e+00> : vector<8x256xf32>
    %42 = tpu.matmul %41, %3, %cst_37 {dimension_numbers = #tpu.dot_dimension_numbers<[1], [0], [0], [1], [0, 0, 1, 1], [], []>} : vector<8x8xf32>, vector<8x256xf32>, vector<8x256xf32> -> vector<8x256xf32>
    %43 = arith.addf %39, %42 : vector<8x256xf32>
    %c7 = arith.constant 7 : index
    %c0_38 = arith.constant 0 : index
    %c0_39 = arith.constant 0 : index
    %44 = vector.load %arg3[%c7, %c0_38, %c0_39] : memref<9x8x8xf32, #tpu.memory_space<vmem>>, vector<1x8x8xf32>
    %45 = vector.shape_cast %44 : vector<1x8x8xf32> to vector<8x8xf32>
    %cst_40 = arith.constant dense<0.000000e+00> : vector<8x256xf32>
    %46 = tpu.matmul %45, %0, %cst_40 {dimension_numbers = #tpu.dot_dimension_numbers<[1], [0], [0], [1], [0, 0, 1, 1], [], []>} : vector<8x8xf32>, vector<8x256xf32>, vector<8x256xf32> -> vector<8x256xf32>
    %47 = arith.addf %43, %46 : vector<8x256xf32>
    %c8 = arith.constant 8 : index
    %c0_41 = arith.constant 0 : index
    %c0_42 = arith.constant 0 : index
    %48 = vector.load %arg3[%c8, %c0_41, %c0_42] : memref<9x8x8xf32, #tpu.memory_space<vmem>>, vector<1x8x8xf32>
    %49 = vector.shape_cast %48 : vector<1x8x8xf32> to vector<8x8xf32>
    %cst_43 = arith.constant dense<0.000000e+00> : vector<8x256xf32>
    %50 = tpu.matmul %49, %6, %cst_43 {dimension_numbers = #tpu.dot_dimension_numbers<[1], [0], [0], [1], [0, 0, 1, 1], [], []>} : vector<8x8xf32>, vector<8x256xf32>, vector<8x256xf32> -> vector<8x256xf32>
    %51 = arith.addf %47, %50 : vector<8x256xf32>
    %c2_44 = arith.constant 2 : index
    %c0_45 = arith.constant 0 : index
    %c0_46 = arith.constant 0 : index
    %52 = vector.load %arg2[%c2_44, %c0_45, %c0_46] : memref<4x256x256xf32, #tpu.memory_space<vmem>>, vector<1x256x256xf32>
    %53 = vector.shape_cast %52 : vector<1x256x256xf32> to vector<256x256xf32>
    %cst_47 = arith.constant dense<0.000000e+00> : vector<8x256xf32>
    %54 = tpu.matmul %51, %53, %cst_47 {dimension_numbers = #tpu.dot_dimension_numbers<[1], [0], [0], [1], [0, 0, 1, 1], [], []>} : vector<8x256xf32>, vector<256x256xf32>, vector<8x256xf32> -> vector<8x256xf32>
    %55 = arith.addf %38, %54 : vector<8x256xf32>
    %c0_48 = arith.constant 0 : index
    %c0_49 = arith.constant 0 : index
    %56 = vector.load %arg4[%c0_48, %c0_49] : memref<8x1xf32, #tpu.memory_space<vmem>>, vector<8x1xf32>
    %57 = vector.broadcast %56 : vector<8x1xf32> to vector<8x256xf32>
    %58 = arith.addf %55, %57 : vector<8x256xf32>
    %cst_50 = arith.constant 0.000000e+00 : f32
    %59 = vector.broadcast %cst_50 : f32 to vector<8x256xf32>
    %60 = arith.maximumf %58, %59 : vector<8x256xf32>
    %c1_51 = arith.constant 1 : index
    %c0_52 = arith.constant 0 : index
    %c0_53 = arith.constant 0 : index
    %61 = vector.load %arg2[%c1_51, %c0_52, %c0_53] : memref<4x256x256xf32, #tpu.memory_space<vmem>>, vector<1x256x256xf32>
    %62 = vector.shape_cast %61 : vector<1x256x256xf32> to vector<256x256xf32>
    %cst_54 = arith.constant dense<0.000000e+00> : vector<8x256xf32>
    %63 = tpu.matmul %60, %62, %cst_54 {dimension_numbers = #tpu.dot_dimension_numbers<[1], [0], [0], [1], [0, 0, 1, 1], [], []>} : vector<8x256xf32>, vector<256x256xf32>, vector<8x256xf32> -> vector<8x256xf32>
    %c0_55 = arith.constant 0 : index
    %c0_56 = arith.constant 0 : index
    %c0_57 = arith.constant 0 : index
    %64 = vector.load %arg2[%c0_55, %c0_56, %c0_57] : memref<4x256x256xf32, #tpu.memory_space<vmem>>, vector<1x256x256xf32>
    %65 = vector.shape_cast %64 : vector<1x256x256xf32> to vector<256x256xf32>
    %cst_58 = arith.constant dense<0.000000e+00> : vector<8x256xf32>
    %66 = tpu.matmul %60, %65, %cst_58 {dimension_numbers = #tpu.dot_dimension_numbers<[1], [0], [0], [1], [0, 0, 1, 1], [], []>} : vector<8x256xf32>, vector<256x256xf32>, vector<8x256xf32> -> vector<8x256xf32>
    %cst_59 = arith.constant 0.000000e+00 : f32
    %67 = vector.broadcast %cst_59 : f32 to vector<4x256xf32>
    %cst_60 = arith.constant 0.000000e+00 : f32
    %68 = vector.broadcast %cst_60 : f32 to vector<4x256xf32>
    %c0_61 = arith.constant 0 : index
    %c0_62 = arith.constant 0 : index
    %c0_63 = arith.constant 0 : index
    %69 = vector.load %arg5[%c0_61, %c0_62, %c0_63] : memref<9x4x8xf32, #tpu.memory_space<vmem>>, vector<1x4x8xf32>
    %70 = vector.shape_cast %69 : vector<1x4x8xf32> to vector<4x8xf32>
    %cst_64 = arith.constant dense<0.000000e+00> : vector<4x256xf32>
    %71 = tpu.matmul %70, %63, %cst_64 {dimension_numbers = #tpu.dot_dimension_numbers<[1], [0], [0], [1], [0, 0, 1, 1], [], []>} : vector<4x8xf32>, vector<8x256xf32>, vector<4x256xf32> -> vector<4x256xf32>
    %72 = arith.addf %68, %71 : vector<4x256xf32>
    %c1_65 = arith.constant 1 : index
    %c0_66 = arith.constant 0 : index
    %c0_67 = arith.constant 0 : index
    %73 = vector.load %arg5[%c1_65, %c0_66, %c0_67] : memref<9x4x8xf32, #tpu.memory_space<vmem>>, vector<1x4x8xf32>
    %74 = vector.shape_cast %73 : vector<1x4x8xf32> to vector<4x8xf32>
    %cst_68 = arith.constant dense<0.000000e+00> : vector<4x256xf32>
    %75 = tpu.matmul %74, %60, %cst_68 {dimension_numbers = #tpu.dot_dimension_numbers<[1], [0], [0], [1], [0, 0, 1, 1], [], []>} : vector<4x8xf32>, vector<8x256xf32>, vector<4x256xf32> -> vector<4x256xf32>
    %76 = arith.addf %72, %75 : vector<4x256xf32>
    %c2_69 = arith.constant 2 : index
    %c0_70 = arith.constant 0 : index
    %c0_71 = arith.constant 0 : index
    %77 = vector.load %arg5[%c2_69, %c0_70, %c0_71] : memref<9x4x8xf32, #tpu.memory_space<vmem>>, vector<1x4x8xf32>
    %78 = vector.shape_cast %77 : vector<1x4x8xf32> to vector<4x8xf32>
    %cst_72 = arith.constant dense<0.000000e+00> : vector<4x256xf32>
    %79 = tpu.matmul %78, %66, %cst_72 {dimension_numbers = #tpu.dot_dimension_numbers<[1], [0], [0], [1], [0, 0, 1, 1], [], []>} : vector<4x8xf32>, vector<8x256xf32>, vector<4x256xf32> -> vector<4x256xf32>
    %80 = arith.addf %76, %79 : vector<4x256xf32>
    %c3_73 = arith.constant 3 : index
    %c0_74 = arith.constant 0 : index
    %c0_75 = arith.constant 0 : index
    %81 = vector.load %arg2[%c3_73, %c0_74, %c0_75] : memref<4x256x256xf32, #tpu.memory_space<vmem>>, vector<1x256x256xf32>
    %82 = vector.shape_cast %81 : vector<1x256x256xf32> to vector<256x256xf32>
    %cst_76 = arith.constant dense<0.000000e+00> : vector<4x256xf32>
    %83 = tpu.matmul %80, %82, %cst_76 {dimension_numbers = #tpu.dot_dimension_numbers<[1], [0], [0], [1], [0, 0, 1, 1], [], []>} : vector<4x256xf32>, vector<256x256xf32>, vector<4x256xf32> -> vector<4x256xf32>
    %84 = arith.addf %67, %83 : vector<4x256xf32>
    %cst_77 = arith.constant 0.000000e+00 : f32
    %85 = vector.broadcast %cst_77 : f32 to vector<4x256xf32>
    %c3_78 = arith.constant 3 : index
    %c0_79 = arith.constant 0 : index
    %c0_80 = arith.constant 0 : index
    %86 = vector.load %arg5[%c3_78, %c0_79, %c0_80] : memref<9x4x8xf32, #tpu.memory_space<vmem>>, vector<1x4x8xf32>
    %87 = vector.shape_cast %86 : vector<1x4x8xf32> to vector<4x8xf32>
    %cst_81 = arith.constant dense<0.000000e+00> : vector<4x256xf32>
    %88 = tpu.matmul %87, %63, %cst_81 {dimension_numbers = #tpu.dot_dimension_numbers<[1], [0], [0], [1], [0, 0, 1, 1], [], []>} : vector<4x8xf32>, vector<8x256xf32>, vector<4x256xf32> -> vector<4x256xf32>
    %89 = arith.addf %85, %88 : vector<4x256xf32>
    %c4_82 = arith.constant 4 : index
    %c0_83 = arith.constant 0 : index
    %c0_84 = arith.constant 0 : index
    %90 = vector.load %arg5[%c4_82, %c0_83, %c0_84] : memref<9x4x8xf32, #tpu.memory_space<vmem>>, vector<1x4x8xf32>
    %91 = vector.shape_cast %90 : vector<1x4x8xf32> to vector<4x8xf32>
    %cst_85 = arith.constant dense<0.000000e+00> : vector<4x256xf32>
    %92 = tpu.matmul %91, %60, %cst_85 {dimension_numbers = #tpu.dot_dimension_numbers<[1], [0], [0], [1], [0, 0, 1, 1], [], []>} : vector<4x8xf32>, vector<8x256xf32>, vector<4x256xf32> -> vector<4x256xf32>
    %93 = arith.addf %89, %92 : vector<4x256xf32>
    %c5_86 = arith.constant 5 : index
    %c0_87 = arith.constant 0 : index
    %c0_88 = arith.constant 0 : index
    %94 = vector.load %arg5[%c5_86, %c0_87, %c0_88] : memref<9x4x8xf32, #tpu.memory_space<vmem>>, vector<1x4x8xf32>
    %95 = vector.shape_cast %94 : vector<1x4x8xf32> to vector<4x8xf32>
    %cst_89 = arith.constant dense<0.000000e+00> : vector<4x256xf32>
    %96 = tpu.matmul %95, %66, %cst_89 {dimension_numbers = #tpu.dot_dimension_numbers<[1], [0], [0], [1], [0, 0, 1, 1], [], []>} : vector<4x8xf32>, vector<8x256xf32>, vector<4x256xf32> -> vector<4x256xf32>
    %97 = arith.addf %93, %96 : vector<4x256xf32>
    %98 = arith.addf %84, %97 : vector<4x256xf32>
    %cst_90 = arith.constant 0.000000e+00 : f32
    %99 = vector.broadcast %cst_90 : f32 to vector<4x256xf32>
    %c6_91 = arith.constant 6 : index
    %c0_92 = arith.constant 0 : index
    %c0_93 = arith.constant 0 : index
    %100 = vector.load %arg5[%c6_91, %c0_92, %c0_93] : memref<9x4x8xf32, #tpu.memory_space<vmem>>, vector<1x4x8xf32>
    %101 = vector.shape_cast %100 : vector<1x4x8xf32> to vector<4x8xf32>
    %cst_94 = arith.constant dense<0.000000e+00> : vector<4x256xf32>
    %102 = tpu.matmul %101, %63, %cst_94 {dimension_numbers = #tpu.dot_dimension_numbers<[1], [0], [0], [1], [0, 0, 1, 1], [], []>} : vector<4x8xf32>, vector<8x256xf32>, vector<4x256xf32> -> vector<4x256xf32>
    %103 = arith.addf %99, %102 : vector<4x256xf32>
    %c7_95 = arith.constant 7 : index
    %c0_96 = arith.constant 0 : index
    %c0_97 = arith.constant 0 : index
    %104 = vector.load %arg5[%c7_95, %c0_96, %c0_97] : memref<9x4x8xf32, #tpu.memory_space<vmem>>, vector<1x4x8xf32>
    %105 = vector.shape_cast %104 : vector<1x4x8xf32> to vector<4x8xf32>
    %cst_98 = arith.constant dense<0.000000e+00> : vector<4x256xf32>
    %106 = tpu.matmul %105, %60, %cst_98 {dimension_numbers = #tpu.dot_dimension_numbers<[1], [0], [0], [1], [0, 0, 1, 1], [], []>} : vector<4x8xf32>, vector<8x256xf32>, vector<4x256xf32> -> vector<4x256xf32>
    %107 = arith.addf %103, %106 : vector<4x256xf32>
    %c8_99 = arith.constant 8 : index
    %c0_100 = arith.constant 0 : index
    %c0_101 = arith.constant 0 : index
    %108 = vector.load %arg5[%c8_99, %c0_100, %c0_101] : memref<9x4x8xf32, #tpu.memory_space<vmem>>, vector<1x4x8xf32>
    %109 = vector.shape_cast %108 : vector<1x4x8xf32> to vector<4x8xf32>
    %cst_102 = arith.constant dense<0.000000e+00> : vector<4x256xf32>
    %110 = tpu.matmul %109, %66, %cst_102 {dimension_numbers = #tpu.dot_dimension_numbers<[1], [0], [0], [1], [0, 0, 1, 1], [], []>} : vector<4x8xf32>, vector<8x256xf32>, vector<4x256xf32> -> vector<4x256xf32>
    %111 = arith.addf %107, %110 : vector<4x256xf32>
    %c2_103 = arith.constant 2 : index
    %c0_104 = arith.constant 0 : index
    %c0_105 = arith.constant 0 : index
    %112 = vector.load %arg2[%c2_103, %c0_104, %c0_105] : memref<4x256x256xf32, #tpu.memory_space<vmem>>, vector<1x256x256xf32>
    %113 = vector.shape_cast %112 : vector<1x256x256xf32> to vector<256x256xf32>
    %cst_106 = arith.constant dense<0.000000e+00> : vector<4x256xf32>
    %114 = tpu.matmul %111, %113, %cst_106 {dimension_numbers = #tpu.dot_dimension_numbers<[1], [0], [0], [1], [0, 0, 1, 1], [], []>} : vector<4x256xf32>, vector<256x256xf32>, vector<4x256xf32> -> vector<4x256xf32>
    %115 = arith.addf %98, %114 : vector<4x256xf32>
    %c0_107 = arith.constant 0 : index
    %c0_108 = arith.constant 0 : index
    %116 = vector.load %arg6[%c0_107, %c0_108] : memref<4x1xf32, #tpu.memory_space<vmem>>, vector<4x1xf32>
    %117 = vector.broadcast %116 : vector<4x1xf32> to vector<4x256xf32>
    %118 = arith.addf %115, %117 : vector<4x256xf32>
    %c0_109 = arith.constant 0 : index
    %c0_110 = arith.constant 0 : index
    %119 = vector.load %arg7[%c0_109, %c0_110] : memref<4x256xf32, #tpu.memory_space<vmem>>, vector<4x256xf32>
    %120 = arith.addf %118, %119 : vector<4x256xf32>
    %cst_111 = arith.constant 0.000000e+00 : f32
    %121 = vector.broadcast %cst_111 : f32 to vector<4x256xf32>
    %122 = arith.maximumf %120, %121 : vector<4x256xf32>
    %c1_112 = arith.constant 1 : index
    %c0_113 = arith.constant 0 : index
    %c0_114 = arith.constant 0 : index
    %123 = vector.load %arg2[%c1_112, %c0_113, %c0_114] : memref<4x256x256xf32, #tpu.memory_space<vmem>>, vector<1x256x256xf32>
    %124 = vector.shape_cast %123 : vector<1x256x256xf32> to vector<256x256xf32>
    %cst_115 = arith.constant dense<0.000000e+00> : vector<4x256xf32>
    %125 = tpu.matmul %122, %124, %cst_115 {dimension_numbers = #tpu.dot_dimension_numbers<[1], [0], [0], [1], [0, 0, 1, 1], [], []>} : vector<4x256xf32>, vector<256x256xf32>, vector<4x256xf32> -> vector<4x256xf32>
    %c0_116 = arith.constant 0 : index
    %c0_117 = arith.constant 0 : index
    %c0_118 = arith.constant 0 : index
    %126 = vector.load %arg2[%c0_116, %c0_117, %c0_118] : memref<4x256x256xf32, #tpu.memory_space<vmem>>, vector<1x256x256xf32>
    %127 = vector.shape_cast %126 : vector<1x256x256xf32> to vector<256x256xf32>
    %cst_119 = arith.constant dense<0.000000e+00> : vector<4x256xf32>
    %128 = tpu.matmul %122, %127, %cst_119 {dimension_numbers = #tpu.dot_dimension_numbers<[1], [0], [0], [1], [0, 0, 1, 1], [], []>} : vector<4x256xf32>, vector<256x256xf32>, vector<4x256xf32> -> vector<4x256xf32>
    %cst_120 = arith.constant 0.000000e+00 : f32
    %129 = vector.broadcast %cst_120 : f32 to vector<4x256xf32>
    %cst_121 = arith.constant 0.000000e+00 : f32
    %130 = vector.broadcast %cst_121 : f32 to vector<4x256xf32>
    %c0_122 = arith.constant 0 : index
    %c0_123 = arith.constant 0 : index
    %c0_124 = arith.constant 0 : index
    %131 = vector.load %arg8[%c0_122, %c0_123, %c0_124] : memref<9x4x4xf32, #tpu.memory_space<vmem>>, vector<1x4x4xf32>
    %132 = vector.shape_cast %131 : vector<1x4x4xf32> to vector<4x4xf32>
    %cst_125 = arith.constant dense<0.000000e+00> : vector<4x256xf32>
    %133 = tpu.matmul %132, %125, %cst_125 {dimension_numbers = #tpu.dot_dimension_numbers<[1], [0], [0], [1], [0, 0, 1, 1], [], []>} : vector<4x4xf32>, vector<4x256xf32>, vector<4x256xf32> -> vector<4x256xf32>
    %134 = arith.addf %130, %133 : vector<4x256xf32>
    %c1_126 = arith.constant 1 : index
    %c0_127 = arith.constant 0 : index
    %c0_128 = arith.constant 0 : index
    %135 = vector.load %arg8[%c1_126, %c0_127, %c0_128] : memref<9x4x4xf32, #tpu.memory_space<vmem>>, vector<1x4x4xf32>
    %136 = vector.shape_cast %135 : vector<1x4x4xf32> to vector<4x4xf32>
    %cst_129 = arith.constant dense<0.000000e+00> : vector<4x256xf32>
    %137 = tpu.matmul %136, %122, %cst_129 {dimension_numbers = #tpu.dot_dimension_numbers<[1], [0], [0], [1], [0, 0, 1, 1], [], []>} : vector<4x4xf32>, vector<4x256xf32>, vector<4x256xf32> -> vector<4x256xf32>
    %138 = arith.addf %134, %137 : vector<4x256xf32>
    %c2_130 = arith.constant 2 : index
    %c0_131 = arith.constant 0 : index
    %c0_132 = arith.constant 0 : index
    %139 = vector.load %arg8[%c2_130, %c0_131, %c0_132] : memref<9x4x4xf32, #tpu.memory_space<vmem>>, vector<1x4x4xf32>
    %140 = vector.shape_cast %139 : vector<1x4x4xf32> to vector<4x4xf32>
    %cst_133 = arith.constant dense<0.000000e+00> : vector<4x256xf32>
    %141 = tpu.matmul %140, %128, %cst_133 {dimension_numbers = #tpu.dot_dimension_numbers<[1], [0], [0], [1], [0, 0, 1, 1], [], []>} : vector<4x4xf32>, vector<4x256xf32>, vector<4x256xf32> -> vector<4x256xf32>
    %142 = arith.addf %138, %141 : vector<4x256xf32>
    %c3_134 = arith.constant 3 : index
    %c0_135 = arith.constant 0 : index
    %c0_136 = arith.constant 0 : index
    %143 = vector.load %arg2[%c3_134, %c0_135, %c0_136] : memref<4x256x256xf32, #tpu.memory_space<vmem>>, vector<1x256x256xf32>
    %144 = vector.shape_cast %143 : vector<1x256x256xf32> to vector<256x256xf32>
    %cst_137 = arith.constant dense<0.000000e+00> : vector<4x256xf32>
    %145 = tpu.matmul %142, %144, %cst_137 {dimension_numbers = #tpu.dot_dimension_numbers<[1], [0], [0], [1], [0, 0, 1, 1], [], []>} : vector<4x256xf32>, vector<256x256xf32>, vector<4x256xf32> -> vector<4x256xf32>
    %146 = arith.addf %129, %145 : vector<4x256xf32>
    %cst_138 = arith.constant 0.000000e+00 : f32
    %147 = vector.broadcast %cst_138 : f32 to vector<4x256xf32>
    %c3_139 = arith.constant 3 : index
    %c0_140 = arith.constant 0 : index
    %c0_141 = arith.constant 0 : index
    %148 = vector.load %arg8[%c3_139, %c0_140, %c0_141] : memref<9x4x4xf32, #tpu.memory_space<vmem>>, vector<1x4x4xf32>
    %149 = vector.shape_cast %148 : vector<1x4x4xf32> to vector<4x4xf32>
    %cst_142 = arith.constant dense<0.000000e+00> : vector<4x256xf32>
    %150 = tpu.matmul %149, %125, %cst_142 {dimension_numbers = #tpu.dot_dimension_numbers<[1], [0], [0], [1], [0, 0, 1, 1], [], []>} : vector<4x4xf32>, vector<4x256xf32>, vector<4x256xf32> -> vector<4x256xf32>
    %151 = arith.addf %147, %150 : vector<4x256xf32>
    %c4_143 = arith.constant 4 : index
    %c0_144 = arith.constant 0 : index
    %c0_145 = arith.constant 0 : index
    %152 = vector.load %arg8[%c4_143, %c0_144, %c0_145] : memref<9x4x4xf32, #tpu.memory_space<vmem>>, vector<1x4x4xf32>
    %153 = vector.shape_cast %152 : vector<1x4x4xf32> to vector<4x4xf32>
    %cst_146 = arith.constant dense<0.000000e+00> : vector<4x256xf32>
    %154 = tpu.matmul %153, %122, %cst_146 {dimension_numbers = #tpu.dot_dimension_numbers<[1], [0], [0], [1], [0, 0, 1, 1], [], []>} : vector<4x4xf32>, vector<4x256xf32>, vector<4x256xf32> -> vector<4x256xf32>
    %155 = arith.addf %151, %154 : vector<4x256xf32>
    %c5_147 = arith.constant 5 : index
    %c0_148 = arith.constant 0 : index
    %c0_149 = arith.constant 0 : index
    %156 = vector.load %arg8[%c5_147, %c0_148, %c0_149] : memref<9x4x4xf32, #tpu.memory_space<vmem>>, vector<1x4x4xf32>
    %157 = vector.shape_cast %156 : vector<1x4x4xf32> to vector<4x4xf32>
    %cst_150 = arith.constant dense<0.000000e+00> : vector<4x256xf32>
    %158 = tpu.matmul %157, %128, %cst_150 {dimension_numbers = #tpu.dot_dimension_numbers<[1], [0], [0], [1], [0, 0, 1, 1], [], []>} : vector<4x4xf32>, vector<4x256xf32>, vector<4x256xf32> -> vector<4x256xf32>
    %159 = arith.addf %155, %158 : vector<4x256xf32>
    %160 = arith.addf %146, %159 : vector<4x256xf32>
    %cst_151 = arith.constant 0.000000e+00 : f32
    %161 = vector.broadcast %cst_151 : f32 to vector<4x256xf32>
    %c6_152 = arith.constant 6 : index
    %c0_153 = arith.constant 0 : index
    %c0_154 = arith.constant 0 : index
    %162 = vector.load %arg8[%c6_152, %c0_153, %c0_154] : memref<9x4x4xf32, #tpu.memory_space<vmem>>, vector<1x4x4xf32>
    %163 = vector.shape_cast %162 : vector<1x4x4xf32> to vector<4x4xf32>
    %cst_155 = arith.constant dense<0.000000e+00> : vector<4x256xf32>
    %164 = tpu.matmul %163, %125, %cst_155 {dimension_numbers = #tpu.dot_dimension_numbers<[1], [0], [0], [1], [0, 0, 1, 1], [], []>} : vector<4x4xf32>, vector<4x256xf32>, vector<4x256xf32> -> vector<4x256xf32>
    %165 = arith.addf %161, %164 : vector<4x256xf32>
    %c7_156 = arith.constant 7 : index
    %c0_157 = arith.constant 0 : index
    %c0_158 = arith.constant 0 : index
    %166 = vector.load %arg8[%c7_156, %c0_157, %c0_158] : memref<9x4x4xf32, #tpu.memory_space<vmem>>, vector<1x4x4xf32>
    %167 = vector.shape_cast %166 : vector<1x4x4xf32> to vector<4x4xf32>
    %cst_159 = arith.constant dense<0.000000e+00> : vector<4x256xf32>
    %168 = tpu.matmul %167, %122, %cst_159 {dimension_numbers = #tpu.dot_dimension_numbers<[1], [0], [0], [1], [0, 0, 1, 1], [], []>} : vector<4x4xf32>, vector<4x256xf32>, vector<4x256xf32> -> vector<4x256xf32>
    %169 = arith.addf %165, %168 : vector<4x256xf32>
    %c8_160 = arith.constant 8 : index
    %c0_161 = arith.constant 0 : index
    %c0_162 = arith.constant 0 : index
    %170 = vector.load %arg8[%c8_160, %c0_161, %c0_162] : memref<9x4x4xf32, #tpu.memory_space<vmem>>, vector<1x4x4xf32>
    %171 = vector.shape_cast %170 : vector<1x4x4xf32> to vector<4x4xf32>
    %cst_163 = arith.constant dense<0.000000e+00> : vector<4x256xf32>
    %172 = tpu.matmul %171, %128, %cst_163 {dimension_numbers = #tpu.dot_dimension_numbers<[1], [0], [0], [1], [0, 0, 1, 1], [], []>} : vector<4x4xf32>, vector<4x256xf32>, vector<4x256xf32> -> vector<4x256xf32>
    %173 = arith.addf %169, %172 : vector<4x256xf32>
    %c2_164 = arith.constant 2 : index
    %c0_165 = arith.constant 0 : index
    %c0_166 = arith.constant 0 : index
    %174 = vector.load %arg2[%c2_164, %c0_165, %c0_166] : memref<4x256x256xf32, #tpu.memory_space<vmem>>, vector<1x256x256xf32>
    %175 = vector.shape_cast %174 : vector<1x256x256xf32> to vector<256x256xf32>
    %cst_167 = arith.constant dense<0.000000e+00> : vector<4x256xf32>
    %176 = tpu.matmul %173, %175, %cst_167 {dimension_numbers = #tpu.dot_dimension_numbers<[1], [0], [0], [1], [0, 0, 1, 1], [], []>} : vector<4x256xf32>, vector<256x256xf32>, vector<4x256xf32> -> vector<4x256xf32>
    %177 = arith.addf %160, %176 : vector<4x256xf32>
    %c0_168 = arith.constant 0 : index
    %c0_169 = arith.constant 0 : index
    %178 = vector.load %arg9[%c0_168, %c0_169] : memref<4x1xf32, #tpu.memory_space<vmem>>, vector<4x1xf32>
    %179 = vector.broadcast %178 : vector<4x1xf32> to vector<4x256xf32>
    %180 = arith.addf %177, %179 : vector<4x256xf32>
    %c0_170 = arith.constant 0 : index
    %c0_171 = arith.constant 0 : index
    %181 = vector.load %arg10[%c0_170, %c0_171] : memref<4x256xf32, #tpu.memory_space<vmem>>, vector<4x256xf32>
    %182 = arith.addf %180, %181 : vector<4x256xf32>
    %cst_172 = arith.constant 0.000000e+00 : f32
    %183 = vector.broadcast %cst_172 : f32 to vector<4x256xf32>
    %184 = arith.subf %183, %182 : vector<4x256xf32>
    %185 = math.exp %184 : vector<4x256xf32>
    %cst_173 = arith.constant 1.000000e+00 : f32
    %186 = vector.broadcast %cst_173 : f32 to vector<4x256xf32>
    %187 = arith.addf %186, %185 : vector<4x256xf32>
    %cst_174 = arith.constant 1.000000e+00 : f32
    %188 = vector.broadcast %cst_174 : f32 to vector<4x256xf32>
    %189 = arith.divf %188, %187 : vector<4x256xf32>
    %c0_175 = arith.constant 0 : index
    %c0_176 = arith.constant 0 : index
    %190 = vector.load %arg11[%c0_175, %c0_176] : memref<4x256xf32, #tpu.memory_space<vmem>>, vector<4x256xf32>
    tpu.vector_store %arg11[%c0_175, %c0_176], %189 {strides = array<i32>} : memref<4x256xf32, #tpu.memory_space<vmem>>, vector<4x256xf32>,
    return
  }
  func.func @transform_0(%arg0: i32) -> (i32, i32) {
    %c0_i32 = arith.constant 0 : i32
    %c0_i32_0 = arith.constant 0 : i32
    return %c0_i32, %arg0 : i32, i32
  }
  func.func @transform_1(%arg0: i32) -> (i32, i32, i32) {
    %c0_i32 = arith.constant 0 : i32
    %c0_i32_0 = arith.constant 0 : i32
    %c0_i32_1 = arith.constant 0 : i32
    %c0_i32_2 = arith.constant 0 : i32
    return %c0_i32, %c0_i32_0, %c0_i32_1 : i32, i32, i32
  }
  func.func @transform_2(%arg0: i32) -> (i32, i32, i32) {
    %c0_i32 = arith.constant 0 : i32
    %c0_i32_0 = arith.constant 0 : i32
    %c0_i32_1 = arith.constant 0 : i32
    %c0_i32_2 = arith.constant 0 : i32
    return %c0_i32, %c0_i32_0, %c0_i32_1 : i32, i32, i32
  }
  func.func @transform_3(%arg0: i32) -> (i32, i32) {
    %c0_i32 = arith.constant 0 : i32
    %c0_i32_0 = arith.constant 0 : i32
    %c0_i32_1 = arith.constant 0 : i32
    return %c0_i32, %c0_i32_0 : i32, i32
  }
  func.func @transform_4(%arg0: i32) -> (i32, i32, i32) {
    %c0_i32 = arith.constant 0 : i32
    %c0_i32_0 = arith.constant 0 : i32
    %c0_i32_1 = arith.constant 0 : i32
    %c0_i32_2 = arith.constant 0 : i32
    return %c0_i32, %c0_i32_0, %c0_i32_1 : i32, i32, i32
  }
  func.func @transform_5(%arg0: i32) -> (i32, i32) {
    %c0_i32 = arith.constant 0 : i32
    %c0_i32_0 = arith.constant 0 : i32
    %c0_i32_1 = arith.constant 0 : i32
    return %c0_i32, %c0_i32_0 : i32, i32
  }
  func.func @transform_6(%arg0: i32) -> (i32, i32) {
    %c0_i32 = arith.constant 0 : i32
    %c0_i32_0 = arith.constant 0 : i32
    return %c0_i32, %arg0 : i32, i32
  }
  func.func @transform_7(%arg0: i32) -> (i32, i32, i32) {
    %c0_i32 = arith.constant 0 : i32
    %c0_i32_0 = arith.constant 0 : i32
    %c0_i32_1 = arith.constant 0 : i32
    %c0_i32_2 = arith.constant 0 : i32
    return %c0_i32, %c0_i32_0, %c0_i32_1 : i32, i32, i32
  }
  func.func @transform_8(%arg0: i32) -> (i32, i32) {
    %c0_i32 = arith.constant 0 : i32
    %c0_i32_0 = arith.constant 0 : i32
    %c0_i32_1 = arith.constant 0 : i32
    return %c0_i32, %c0_i32_0 : i32, i32
  }
  func.func @transform_9(%arg0: i32) -> (i32, i32) {
    %c0_i32 = arith.constant 0 : i32
    %c0_i32_0 = arith.constant 0 : i32
    return %c0_i32, %arg0 : i32, i32
  }
  func.func @transform_10(%arg0: i32) -> (i32, i32) {
    %c0_i32 = arith.constant 0 : i32
    %c0_i32_0 = arith.constant 0 : i32
    return %c0_i32, %arg0 : i32, i32
  }
}

</mosaic_0001>

<bundles_post_ra>
// kernel: tpu_custom_call.1
= control target key start
LH: loop header
LB: loop body
LE: loop exit
PB: predicated region body
PF: predicated region fallthrough
CT: control target
= control target key end

     0   :  { %15 = vsyncpa [#allocation3], 0  ;;  %s5916_s0 = inlined_call_operand.vmem [shape: f32[8,512], index: 0, kind: input, shape index: {}]   ;;  %s5917_s1 = inlined_call_operand.hbm [shape: f32[4,256,256], index: 1, kind: input, shape index: {}]   ;;  %s5918_s2 = inlined_call_operand.vmem [shape: f32[9,8,8], index: 2, kind: input, shape index: {}]   ;;  %s5919_s3 = inlined_call_operand.vmem [shape: f32[8,1], index: 3, kind: input, shape index: {}]   ;;  %s5920_s4 = inlined_call_operand.vmem [shape: f32[9,4,8], index: 4, kind: input, shape index: {}]   ;;  %s5921_s5 = inlined_call_operand.vmem [shape: f32[4,1], index: 5, kind: input, shape index: {}]   ;;  %s5922_s6 = inlined_call_operand.vmem [shape: f32[4,512], index: 6, kind: input, shape index: {}]   ;;  %s5923_s7 = inlined_call_operand.vmem [shape: f32[9,4,4], index: 7, kind: input, shape index: {}]   ;;  %s5924_s8 = inlined_call_operand.vmem [shape: f32[4,1], index: 8, kind: input, shape index: {}]   ;;  %s5925_s9 = inlined_call_operand.vmem [shape: f32[4,512], index: 9, kind: input, shape index: {}]   ;;  %s5926_s10 = inlined_call_operand.hbm [shape: f32[4,512], index: 10, kind: output, shape index: {}]  }
   0x1   :  { %16 = vsyncpa [#allocation4], 0 }
   0x2   :  { %18 = vsyncpa [#allocation4 + $0x1], 0  ;;  %s4921_s13 = smov 0   ;;  %s4923_s14 = smov 0  }
   0x3   :  { %s4925_s15 = smov 0   ;;  %s4927_s16 = smov 0  }
   0x4 LB: > { %s4942_s17 = sadd.s32 4294967295, %s4858_s16   ;;  %s3794_s18 = sadd.s32 4294967294, %s4858_s16   ;;  %s4858_s16 = sphi %s4927_s16, %s6288_s16   ;;  %s4854_s15 = sphi %s4925_s15, %s6287_s15   ;;  %s4850_s14 = sphi %s4923_s14, %s6286_s14   ;;  %s4846_s13 = sphi %s4921_s13, %s6285_s13  }
   0x5   : > { %s4946_s19 = sadd.s32 1, %s4858_s16   ;;  %s256_s20 = sadd.s32 1, %s4854_s15 }
   0x6   : > { %s253_s21 = ssub.s32 %s4858_s16, %s4946_s19  ;;  %p266_p0 = scmp.ne.s32.totalorder %s4854_s15, %s4850_s14 }
   0x7   : > { %p254_p1 = scmp.eq.s32.totalorder %s253_s21, 0  ;;  %p267_p2 = scmp.eq.s32.totalorder %s4942_s17, 1 }
   0x8   : > { %p272_p3 = scmp.ne.s32.totalorder %s4850_s14, %s4846_s13  ;;  %p273_p4 = scmp.eq.s32.totalorder %s3794_s18, 1 }
   0x9   : > { %s4957_s22 = scalar_select %p254_p1, %s4854_s15, %s256_s20  }
   0xa   : > { %p4959_p5 = por %p267_p2, %p266_p0  ;;  %p4963_p6 = por %p273_p4, %p272_p3 }
   0xb   : > { %p3795_p7 = scmp.ge.s32.totalorder %s4858_s16, 1  ;;  %p280_p8 = scmp.lt.s32.totalorder %s4858_s16, 3 }
   0xc   : > { %s6072_s23 = scalar_select %p4959_p5, 1, 0 }
   0xd   : > { %s6073_s24 = scalar_select %p4963_p6, 1, 0 }
   0xe   : > { %p5927_p9 = scmp.eq.s32.totalorder %s4942_s17, 0  ;;  %p4970_p10 = pnand %p3795_p7, %p280_p8 }
   0xf   : > { %s4860_s26 = smov [#allocation2]   ;;  %s4764_s11 = scalar_lea.hbm %s5917_s1, 32768 }
  0x10   : > { %s6074_s25 = scalar_select %p4970_p10, 1, 0 }
  0x11   : > { %s292_s27 = sshll.u32 %s4860_s26, 4  ;;  %p4704_p11 = pneg %p4970_p10  ;;  %s293_s27 = int_to_ptr.vmem [resolvable:$true] %s292_s27 }
  0x12   : > { %p4765_p13 = scmp.ne.s32.totalorder %s5917_s1, %s4764_s11  ;;  %p4771_p3 = scmp.lt.u32.totalorder %s4764_s11, %s5917_s1 }
  0x13   : > { %p4978_p12 = pnand %p5927_p9, %p4704_p11 }
  0x15   : > { %p4766_p0 = pneg %p4978_p12 }
  0x17   : > { %p4767_p1 = pnand %p4766_p0, %p4765_p13 }
  0x19   : > { %p4768_p2 = pneg %p4767_p1 }
  0x1b   : > { %p4773_p4 = pnand %p4771_p3, %p4768_p2 }
  0x1d   : > { %4776 = shalt.err (!%p4773_p4)
}
  0x1e   : > { %s4777_s26 = scalar_lea.vmem %s293_s27, 32768  ;;  %p4785_p9 = scmp.lt.s32.totalorder %s293_s27, %s293_s27 }
  0x1f   : > { %p4778_p7 = scmp.ne.s32.totalorder %s293_s27, %s4777_s26  ;;  %p4786_p6 = scmp.lt.s32.totalorder %s4777_s26, %s4777_s26 }
  0x21   : > { %p4780_p8 = pnand %p4778_p7, %p4766_p0  ;;  %p4787_p5 = por %p4786_p6, %p4785_p9 }
  0x23   : > { %p4781_p11 = pneg %p4780_p8 }
  0x25   : > { %p4788_p10 = pnand %p4787_p5, %p4781_p11 }
  0x27   : > { %4791 = shalt.err (!%p4788_p10)
}
  0x28   : > { %s4861_s29 = smov 256   ;;  %s4862_s30 = smov 16  }
  0x29   : > { %4707 = dma.hbm_to_vmem [thread:$0]  (!%p4978_p12), %s5917_s1, 32768, %s293_s27, [#allocation3], %s4861_s29, %s4861_s29, %s4862_s30  }
  0x2a   : > { %p6076_p13 = scmp.ne.s32.totalorder %s6074_s25, 0 }
  0x2c   : > { %353 = sbr.rel (%p6076_p13) target bundleno = 2493 (0x9bd), region = 60 }
  0x33   : > { %p6077_p1 = scmp.eq.s32.totalorder %s4942_s17, 0 }
  0x35   : > { %4837 = dma.done.wait (%p6077_p1), [#allocation3], 32768   ;;  %p6078_p0 = pmov %p6077_p1 }
  0x36   : > { %v424_v0 = vld [vmem:[#allocation2 + $0x208] sm:$0xff]  ;;  %v426_v1 = vld [vmem:[#allocation2 + $0x218] sm:$0xff]  ;;  %v423_v2 = vld [vmem:[#allocation2 + $0x200] sm:$0xff]  ;;  %s3801_s25 = sshll.u32 %s4942_s17, 1  ;;  %v5930_v14 = vmov 0.0   ;;  %vm696_vm0 = vcmask 64512  }
  0x37   : > { %4839 = vsyncadd (%p6078_p0), [#allocation3], 4294934528  ;;  %v5004_v3 = vpack.c.bf16 %v426_v1, %v424_v0  ;;  %v425_v4 = vld [vmem:[#allocation2 + $0x210] sm:$0xff]  ;;  %v428_v5 = vld [vmem:[#allocation2 + $0x228] sm:$0xff]  ;;  %764 = vmatprep.mubr.f32.mxu1 %v5930_v14  ;;  %p402_p5 = scmp.lt.s32.totalorder %s3801_s25, 3  ;;  %vm2807_vm1 = vcmask 1043456  }
  0x38   : > { %v430_v6 = vld [vmem:[#allocation2 + $0x238] sm:$0xff]  ;;  %v5006_v7 = vpack.c.bf16 %v425_v4, %v423_v2  ;;  %v427_v9 = vld [vmem:[#allocation2 + $0x220] sm:$0xff]  ;;  %v429_v10 = vld [vmem:[#allocation2 + $0x230] sm:$0xff]  ;;  %vm2803_vm2 = vcmask 31744   ;;  %p6283_p9 = scmp.ne.s32.totalorder %s6072_s23, 0 }
  0x39   : > { %6079 = vst [vmem:[#allocation8_spill] sm:$0xff] %v5004_v3  ;;  %v5008_v8 = vpack.c.bf16 %v430_v6, %v428_v5  ;;  %v432_v11 = vld [vmem:[#allocation2 + $0x248] sm:$0xff]  ;;  %3883 = vmatprep.subr.bf16.mxu0 %v5004_v3  ;;  %v434_v12 = vld [vmem:[#allocation2 + $0x258] sm:$0xff]  ;;  %v5012_v13 = vpack.c.bf16 %v429_v10, %v427_v9  ;;  %v431_v16 = vld [vmem:[#allocation2 + $0x240] sm:$0xff]  ;;  %s6290_s25 = smov (!%p402_p5, %s3801_s25), 3 }
  0x3a   : > { %6080 = vst [vmem:[#allocation9_spill] sm:$0xff] %v5006_v7  ;;  %3885 = vmatpush1.bf16.msra.mxu0 %v5006_v7  ;;  %v5017_v15 = vpack.c.bf16 %v434_v12, %v432_v11  ;;  %v433_v17 = vld [vmem:[#allocation2 + $0x250] sm:$0xff]  ;;  %v436_v18 = vld [vmem:[#allocation2 + $0x268] sm:$0xff]  ;;  %v438_v19 = vld [vmem:[#allocation2 + $0x278] sm:$0xff]  ;;  %s3802_s27 = sshll.u32 %s6290_s25, 3  ;;  %s3804_s21 = sshll.u32 %s6290_s25, 2 }
  0x3b   : > { %6081 = vst [vmem:[#allocation10_spill] sm:$0xff] %v5012_v13  ;;  %3887 = vmatprep.subr.bf16.mxu0 %v5008_v8  ;;  %v5020_v20 = vpack.c.bf16 %v433_v17, %v431_v16  ;;  %v5023_v21 = vpack.c.bf16 %v438_v19, %v436_v18  ;;  %v435_v22 = vld [vmem:[#allocation2 + $0x260] sm:$0xff]  ;;  %v437_v23 = vld [vmem:[#allocation2 + $0x270] sm:$0xff]  ;;  %v440_v24 = vld [vmem:[#allocation2 + $0x288] sm:$0xff]  ;;  %s405_s20 = scalar_lea.vmem %s5916_s0, %s3802_s27  ;;  %s411_s30 = scalar_lea.vmem %s5922_s6, %s3804_s21 }
  0x3c   : > { %v442_v25 = vld [vmem:[#allocation2 + $0x298] sm:$0xff]  ;;  %v5028_v26 = vpack.c.bf16 %v437_v23, %v435_v22  ;;  %v439_v28 = vld [vmem:[#allocation2 + $0x280] sm:$0xff]  ;;  %v441_v29 = vld [vmem:[#allocation2 + $0x290] sm:$0xff]  ;;  %s417_s11 = scalar_lea.vmem %s5925_s9, %s3804_s21  ;;  %s398_s25 = sand.u32 1, %s4850_s14  }
  0x3d   : > { %6082 = vst [vmem:[#allocation11_spill] sm:$0xff] %v5020_v20  ;;  %v5031_v27 = vpack.c.bf16 %v442_v25, %v440_v24  ;;  %v444_v30 = vld [vmem:[#allocation2 + $0x2a8] sm:$0xff]  ;;  %v446_v31 = vld [vmem:[#allocation2 + $0x2b8] sm:$0xff]  ;;  %v5035_v32 = vpack.c.bf16 %v441_v29, %v439_v28  ;;  %v443_v34 = vld [vmem:[#allocation2 + $0x2a0] sm:$0xff]  ;;  %s3800_s21 = sshll.u32 %s398_s25, 3  ;;  %s3685_s27 = scalar_lea.sflag [#allocation4], %s398_s25 }
  0x3e   : > { %3889 = vmatpush1.bf16.msra.mxu0 %v5012_v13  ;;  %6083 = vst [vmem:[#allocation12_spill] sm:$0xff] %v5028_v26  ;;  %v5038_v33 = vpack.c.bf16 %v446_v31, %v444_v30  ;;  %v445_v35 = vld [vmem:[#allocation2 + $0x2b0] sm:$0xff]  ;;  %v448_v36 = vld [vmem:[#allocation2 + $0x2c8] sm:$0xff]  ;;  %v450_v37 = vld [vmem:[#allocation2 + $0x2d8] sm:$0xff]  ;;  %s400_s26 = scalar_lea.vmem [#allocation5], %s3800_s21 }
  0x3f   : > { %3891 = vmatprep.subr.bf16.mxu0 %v5017_v15  ;;  %6084 = vst [vmem:[#allocation13_spill] sm:$0xff] %v5035_v32  ;;  %v5044_v38 = vpack.c.bf16 %v445_v35, %v443_v34  ;;  %v5047_v39 = vpack.c.bf16 %v450_v37, %v448_v36  ;;  %v447_v40 = vld [vmem:[#allocation2 + $0x2c0] sm:$0xff]  ;;  %v449_v41 = vld [vmem:[#allocation2 + $0x2d0] sm:$0xff]  ;;  %v5049_v42 = vld [vmem:[%s405_s20 + $0x8] sm:$0xff]  ;;  %s3699_s29 = sshll.u32 %s400_s26, 4  ;;  %s5876_s29 = int_to_ptr.vmem [resolvable:$true] %s3699_s29 }
  0x40   : > { %v452_v43 = vld [vmem:[#allocation2 + $0x2e8] sm:$0xff]  ;;  %v454_v44 = vld [vmem:[#allocation2 + $0x2f8] sm:$0xff]  ;;  %551 = vmatprep.mubr.f32.mxu0 %v5049_v42  ;;  %v5052_v45 = vld [vmem:[%s405_s20] sm:$0xff]  ;;  %700 = vmatprep.subr.mxu1 %v5049_v42  ;;  %v5057_v46 = vpack.c.bf16 %v449_v41, %v447_v40  ;;  %s3881_s20 = sshll.u32 %s4942_s17, 7  ;;  %s4792_s28 = scalar_lea.vmem %s5876_s29, 128 }
  0x41   : > { %6085 = vst [vmem:[#allocation14_spill] sm:$0xff] %v5044_v38  ;;  %701 = vmatpush1.msra.mxu1 %v5052_v45  ;;  %v5060_v47 = vpack.c.bf16 %v454_v44, %v452_v43  ;;  %v451_v48 = vld [vmem:[#allocation2 + $0x2e0] sm:$0xff]  ;;  %v453_v49 = vld [vmem:[#allocation2 + $0x2f0] sm:$0xff]  ;;  %v456_v50 = vld [vmem:[#allocation2 + $0x308] sm:$0xff]  ;;  %s5874_s18 = scalar_lea.hbm %s5926_s10, %s3881_s20  ;;  %p4793_p6 = scmp.ne.s32.totalorder %s5876_s29, %s4792_s28 }
  0x42   : > { %3893 = vmatpush1.bf16.msra.mxu0 %v5020_v20  ;;  %6086 = vst [vmem:[#allocation15_spill] sm:$0xff] %v5057_v46  ;;  %v458_v51 = vld [vmem:[#allocation2 + $0x318] sm:$0xff]  ;;  %v5063_v52 = vpack.c.bf16 %v453_v49, %v451_v48  ;;  %v455_v54 = vld [vmem:[#allocation2 + $0x300] sm:$0xff]  ;;  %v457_v55 = vld [vmem:[#allocation2 + $0x310] sm:$0xff]  ;;  %s4865_s17 = smov [#allocation5]  }
  0x43   : > { %3895 = vmatprep.subr.bf16.mxu0 %v5023_v21  ;;  %v5066_v53 = vpack.c.bf16 %v458_v51, %v456_v50  ;;  %v460_v56 = vld [vmem:[#allocation2 + $0x328] sm:$0xff]  ;;  %v462_v57 = vld [vmem:[#allocation2 + $0x338] sm:$0xff]  ;;  %v5069_v58 = vpack.c.bf16 %v457_v55, %v455_v54  ;;  %v459_v60 = vld [vmem:[#allocation2 + $0x320] sm:$0xff]  ;;  %p4794_p10 = pnand %p4793_p6, %p6283_p9 }
  0x44   : > { %v5072_v59 = vpack.c.bf16 %v462_v57, %v460_v56  ;;  %v461_v61 = vld [vmem:[#allocation2 + $0x330] sm:$0xff]  ;;  %v464_v62 = vld [vmem:[#allocation2 + $0x348] sm:$0xff]  ;;  %v466_v63 = vld [vmem:[#allocation2 + $0x358] sm:$0xff] }
  0x45   : > { %v5075_v0 = vpack.c.bf16 %v461_v61, %v459_v60  ;;  %v5078_v1 = vpack.c.bf16 %v466_v63, %v464_v62  ;;  %v463_v2 = vld [vmem:[#allocation2 + $0x340] sm:$0xff]  ;;  %v465_v4 = vld [vmem:[#allocation2 + $0x350] sm:$0xff]  ;;  %v468_v5 = vld [vmem:[#allocation2 + $0x368] sm:$0xff]  ;;  %p4795_p12 = pneg %p4794_p10 }
  0x46   : > { %3897 = vmatpush1.bf16.msra.mxu0 %v5028_v26  ;;  %v470_v6 = vld [vmem:[#allocation2 + $0x378] sm:$0xff]  ;;  %v5081_v9 = vpack.c.bf16 %v465_v4, %v463_v2  ;;  %v467_v11 = vld [vmem:[#allocation2 + $0x360] sm:$0xff]  ;;  %v469_v12 = vld [vmem:[#allocation2 + $0x370] sm:$0xff] }
  0x47   : > { %3899 = vmatprep.subr.bf16.mxu0 %v5031_v27  ;;  %v5084_v10 = vpack.c.bf16 %v470_v6, %v468_v5  ;;  %v472_v16 = vld [vmem:[#allocation2 + $0x388] sm:$0xff]  ;;  %v474_v17 = vld [vmem:[#allocation2 + $0x398] sm:$0xff]  ;;  %v5090_v19 = vpack.c.bf16 %v469_v12, %v467_v11  ;;  %v471_v23 = vld [vmem:[#allocation2 + $0x380] sm:$0xff] }
  0x48   : > { %6087 = vst [vmem:[#allocation16_spill] sm:$0xff] %v5081_v9  ;;  %v3807_v18 = vld [vmem:[%s5918_s2 + $0x8] sm:$0xff]  ;;  %v5094_v22 = vpack.c.bf16 %v474_v17, %v472_v16  ;;  %v473_v24 = vld [vmem:[#allocation2 + $0x390] sm:$0xff]  ;;  %v478_v28 = vld [vmem:[#allocation2 + $0x3b8] sm:$0xff] }
  0x49   : > { %6088 = vst [vmem:[#allocation17_spill] sm:$0xff] %v5084_v10  ;;  %6089 = vst [vmem:[#allocation18_spill] sm:$0xff] %v5090_v19  ;;  %3808 = vmatmul.mubr.msk.f32.vlgmr.msra.gmra.mrb[0].mxu1 %vm696_vm0, %v3807_v18  ;;  %v476_v25 = vld [vmem:[#allocation2 + $0x3a8] sm:$0xff]  ;;  %v5098_v29 = vpack.c.bf16 %v473_v24, %v471_v23  ;;  %v475_v31 = vld [vmem:[#allocation2 + $0x3a0] sm:$0xff] }
  0x4a   : > { %3901 = vmatpush1.bf16.msra.mxu0 %v5035_v32  ;;  %6090 = vst [vmem:[#allocation19_spill] sm:$0xff] %v5094_v22  ;;  %838 = vmatprep.mubr.f32.mxu1 %v5930_v14  ;;  %v5101_v30 = vpack.c.bf16 %v478_v28, %v476_v25  ;;  %v477_v34 = vld [vmem:[#allocation2 + $0x3b0] sm:$0xff]  ;;  %v480_v35 = vld [vmem:[#allocation2 + $0x3c8] sm:$0xff]  ;;  %v482_v36 = vld [vmem:[#allocation2 + $0x3d8] sm:$0xff] }
  0x4b   : > { %3903 = vmatprep.subr.bf16.mxu0 %v5038_v33  ;;  %6091 = vst [vmem:[#allocation20_spill] sm:$0xff] %v5098_v29  ;;  %v5104_v37 = vpack.c.bf16 %v477_v34, %v475_v31  ;;  %v5107_v40 = vpack.c.bf16 %v482_v36, %v480_v35  ;;  %v479_v41 = vld [vmem:[#allocation2 + $0x3c0] sm:$0xff]  ;;  %v481_v43 = vld [vmem:[#allocation2 + $0x3d0] sm:$0xff]  ;;  %v484_v44 = vld [vmem:[#allocation2 + $0x3e8] sm:$0xff] }
  0x4c   : > { %6092 = vst [vmem:[#allocation21_spill] sm:$0xff] %v5101_v30  ;;  %v486_v48 = vld [vmem:[#allocation2 + $0x3f8] sm:$0xff]  ;;  %v5110_v49 = vpack.c.bf16 %v481_v43, %v479_v41  ;;  %v483_v51 = vld [vmem:[#allocation2 + $0x3e0] sm:$0xff]  ;;  %v485_v54 = vld [vmem:[#allocation2 + $0x3f0] sm:$0xff] }
  0x4d   : > { %6093 = vst [vmem:[#allocation22_spill] sm:$0xff] %v5104_v37  ;;  %6094 = vst [vmem:[#allocation23_spill] sm:$0xff] %v5107_v40  ;;  %v5113_v50 = vpack.c.bf16 %v486_v48, %v484_v44  ;;  %v559_v55 = vld [vmem:[#allocation2 + $0x8] sm:$0xff]  ;;  %v561_v56 = vld [vmem:[#allocation2 + $0x18] sm:$0xff]  ;;  %v5116_v57 = vpack.c.bf16 %v485_v54, %v483_v51 }
  0x4e   : > { %3905 = vmatpush1.bf16.msra.mxu0 %v5044_v38  ;;  %6095 = vst [vmem:[#allocation24_spill] sm:$0xff] %v5110_v49  ;;  %v5119_v60 = vpack.c.bf16 %v561_v56, %v559_v55  ;;  %v558_v61 = vld [vmem:[#allocation2] sm:$0xff]  ;;  %v560_v62 = vld [vmem:[#allocation2 + $0x10] sm:$0xff]  ;;  %v563_v63 = vld [vmem:[#allocation2 + $0x28] sm:$0xff] }
  0x4f   : > { %3907 = vmatprep.subr.bf16.mxu0 %v5047_v39  ;;  %6096 = vst [vmem:[#allocation25_spill] sm:$0xff] %v5113_v50  ;;  %6097 = vst [vmem:[#allocation26_spill] sm:$0xff] %v5116_v57  ;;  %v565_v2 = vld [vmem:[#allocation2 + $0x38] sm:$0xff]  ;;  %v5122_v4 = vpack.c.bf16 %v560_v62, %v558_v61  ;;  %v562_v6 = vld [vmem:[#allocation2 + $0x20] sm:$0xff] }
  0x50   : > { %6098 = vst [vmem:[#allocation27_spill] sm:$0xff] %v5119_v60  ;;  %v5125_v5 = vpack.c.bf16 %v565_v2, %v563_v63  ;;  %v564_v11 = vld [vmem:[#allocation2 + $0x30] sm:$0xff]  ;;  %v567_v12 = vld [vmem:[#allocation2 + $0x48] sm:$0xff]  ;;  %v569_v16 = vld [vmem:[#allocation2 + $0x58] sm:$0xff] }
  0x51   : > { %v5129_v17 = vpack.c.bf16 %v564_v11, %v562_v6  ;;  %v5133_v18 = vpack.c.bf16 %v569_v16, %v567_v12  ;;  %v566_v23 = vld [vmem:[#allocation2 + $0x40] sm:$0xff]  ;;  %v568_v24 = vld [vmem:[#allocation2 + $0x50] sm:$0xff]  ;;  %v571_v25 = vld [vmem:[#allocation2 + $0x68] sm:$0xff] }
  0x52   : > { %3909 = vmatpush1.bf16.msra.mxu0 %v5057_v46  ;;  %v573_v28 = vld [vmem:[#allocation2 + $0x78] sm:$0xff]  ;;  %v5136_v31 = vpack.c.bf16 %v568_v24, %v566_v23  ;;  %v570_v35 = vld [vmem:[#allocation2 + $0x60] sm:$0xff]  ;;  %v572_v36 = vld [vmem:[#allocation2 + $0x70] sm:$0xff] }
  0x53   : > { %3911 = vmatprep.subr.bf16.mxu0 %v5060_v47  ;;  %v5139_v34 = vpack.c.bf16 %v573_v28, %v571_v25  ;;  %v575_v41 = vld [vmem:[#allocation2 + $0x88] sm:$0xff]  ;;  %v577_v43 = vld [vmem:[#allocation2 + $0x98] sm:$0xff]  ;;  %v5142_v44 = vpack.c.bf16 %v572_v36, %v570_v35  ;;  %v574_v51 = vld [vmem:[#allocation2 + $0x80] sm:$0xff] }
  0x54   : > { %v5145_v48 = vpack.c.bf16 %v577_v43, %v575_v41  ;;  %v576_v54 = vld [vmem:[#allocation2 + $0x90] sm:$0xff]  ;;  %v579_v55 = vld [vmem:[#allocation2 + $0xa8] sm:$0xff]  ;;  %v581_v56 = vld [vmem:[#allocation2 + $0xb8] sm:$0xff] }
  0x55   : > { %v5148_v61 = vpack.c.bf16 %v576_v54, %v574_v51  ;;  %v5151_v62 = vpack.c.bf16 %v581_v56, %v579_v55  ;;  %v578_v63 = vld [vmem:[#allocation2 + $0xa0] sm:$0xff]  ;;  %v580_v2 = vld [vmem:[#allocation2 + $0xb0] sm:$0xff]  ;;  %v583_v6 = vld [vmem:[#allocation2 + $0xc8] sm:$0xff] }
  0x56   : > { %3913 = vmatpush1.bf16.msra.mxu0 %v5063_v52  ;;  %v585_v11 = vld [vmem:[#allocation2 + $0xd8] sm:$0xff]  ;;  %v5154_v12 = vpack.c.bf16 %v580_v2, %v578_v63  ;;  %v582_v23 = vld [vmem:[#allocation2 + $0xc0] sm:$0xff]  ;;  %v584_v24 = vld [vmem:[#allocation2 + $0xd0] sm:$0xff] }
  0x57   : > { %3915 = vmatprep.subr.bf16.mxu0 %v5066_v53  ;;  %6099 = vst [vmem:[#allocation28_spill] sm:$0xff] %v5151_v62  ;;  %v5157_v16 = vpack.c.bf16 %v585_v11, %v583_v6  ;;  %v587_v25 = vld [vmem:[#allocation2 + $0xe8] sm:$0xff]  ;;  %v589_v28 = vld [vmem:[#allocation2 + $0xf8] sm:$0xff]  ;;  %v5160_v35 = vpack.c.bf16 %v584_v24, %v582_v23  ;;  %v586_v41 = vld [vmem:[#allocation2 + $0xe0] sm:$0xff] }
  0x58   : > { %6100 = vst [vmem:[#allocation29_spill] sm:$0xff] %v5154_v12  ;;  %v5163_v36 = vpack.c.bf16 %v589_v28, %v587_v25  ;;  %v588_v43 = vld [vmem:[#allocation2 + $0xf0] sm:$0xff]  ;;  %v591_v51 = vld [vmem:[#allocation2 + $0x108] sm:$0xff]  ;;  %v593_v54 = vld [vmem:[#allocation2 + $0x118] sm:$0xff] }
  0x59   : > { %6101 = vst [vmem:[#allocation30_spill] sm:$0xff] %v5157_v16  ;;  %6102 = vst [vmem:[#allocation31_spill] sm:$0xff] %v5160_v35  ;;  %v5166_v55 = vpack.c.bf16 %v588_v43, %v586_v41  ;;  %v5169_v56 = vpack.c.bf16 %v593_v54, %v591_v51  ;;  %v590_v63 = vld [vmem:[#allocation2 + $0x100] sm:$0xff]  ;;  %v592_v2 = vld [vmem:[#allocation2 + $0x110] sm:$0xff] }
  0x5a   : > { %3917 = vmatpush1.bf16.msra.mxu0 %v5069_v58  ;;  %6103 = vst [vmem:[#allocation32_spill] sm:$0xff] %v5163_v36  ;;  %v595_v6 = vld [vmem:[#allocation2 + $0x128] sm:$0xff]  ;;  %v597_v11 = vld [vmem:[#allocation2 + $0x138] sm:$0xff]  ;;  %v5172_v23 = vpack.c.bf16 %v592_v2, %v590_v63  ;;  %v594_v25 = vld [vmem:[#allocation2 + $0x120] sm:$0xff] }
  0x5b   : > { %3919 = vmatprep.subr.bf16.mxu0 %v5072_v59  ;;  %6104 = vst [vmem:[#allocation33_spill] sm:$0xff] %v5166_v55  ;;  %6105 = vst [vmem:[#allocation34_spill] sm:$0xff] %v5169_v56  ;;  %v5175_v24 = vpack.c.bf16 %v597_v11, %v595_v6  ;;  %v596_v28 = vld [vmem:[#allocation2 + $0x130] sm:$0xff]  ;;  %v599_v41 = vld [vmem:[#allocation2 + $0x148] sm:$0xff] }
  0x5c   : > { %6106 = vst [vmem:[#allocation35_spill] sm:$0xff] %v5172_v23  ;;  %v601_v43 = vld [vmem:[#allocation2 + $0x158] sm:$0xff]  ;;  %v5178_v51 = vpack.c.bf16 %v596_v28, %v594_v25  ;;  %v598_v14 = vld [vmem:[#allocation2 + $0x140] sm:$0xff]  ;;  %v603_v63 = vld [vmem:[#allocation2 + $0x168] sm:$0xff] }
  0x5d   : > { %6107 = vst [vmem:[#allocation36_spill] sm:$0xff] %v5175_v24  ;;  %v5181_v54 = vpack.c.bf16 %v601_v43, %v599_v41  ;;  %v605_v2 = vld [vmem:[#allocation2 + $0x178] sm:$0xff]  ;;  %v607_v25 = vld [vmem:[#allocation2 + $0x188] sm:$0xff] }
  0x5e   : > { %3921 = vmatpush1.bf16.msra.mxu0 %v5075_v0  ;;  %6108 = vst [vmem:[#allocation37_spill] sm:$0xff] %v5178_v51  ;;  %v5187_v11 = vpack.c.bf16 %v605_v2, %v603_v63  ;;  %v609_v28 = vld [vmem:[#allocation2 + $0x198] sm:$0xff] }
  0x5f   : > { %3923 = vmatprep.subr.bf16.mxu0 %v5078_v1  ;;  %6109 = vst [vmem:[#allocation38_spill] sm:$0xff] %v5181_v54  ;;  %v5193_v43 = vpack.c.bf16 %v609_v28, %v607_v25 }
  0x60   : > { %6111 = vst [vmem:[#allocation40_spill] sm:$0xff] %v5187_v11 }
  0x61   : > { %6113 = vst [vmem:[#allocation42_spill] sm:$0xff] %v5193_v43 }
  0x62   : > { %3925 = vmatpush1.bf16.msra.mxu0 %v5081_v9 }
  0x63   : > { %3927 = vmatprep.subr.bf16.mxu0 %v5084_v10 }
  0x66   : > { %3929 = vmatpush1.bf16.msra.mxu0 %v5090_v19 }
  0x67   : > { %3931 = vmatprep.subr.bf16.mxu0 %v5094_v22 }
  0x6a   : > { %3933 = vmatpush1.bf16.msra.mxu0 %v5098_v29 }
  0x6b   : > { %3935 = vmatprep.subr.bf16.mxu0 %v5101_v30 }
  0x6e   : > { %3937 = vmatpush1.bf16.msra.mxu0 %v5104_v37 }
  0x6f   : > { %3939 = vmatprep.subr.bf16.mxu0 %v5107_v40 }
  0x72   : > { %3941 = vmatpush1.bf16.msra.mxu0 %v5110_v49 }
  0x73   : > { %3943 = vmatprep.subr.bf16.mxu0 %v5113_v50 }
  0x76   : > { %3945 = vmatpush1.bf16.msra.mxu0 %v5116_v57 }
  0x77   : > { %3947 = vmatprep.subr.bf16.mxu0 %v5119_v60 }
  0x79   : > { %552 = vmatmul.mubr.f32.vlgmr.msra.gmra.mrb[0].mxu0 %v5052_v45 }
  0x7a   : > { %3949 = vmatpush1.bf16.msra.mxu0 %v5122_v4  ;;  %686 = vmatprep.mubr.f32.mxu0 %v5049_v42 }
  0x7b   : > { %3951 = vmatprep.subr.bf16.mxu0 %v5125_v5 }
  0x7e   : > { %3953 = vmatpush1.bf16.msra.mxu0 %v5129_v17 }
  0x7f   : > { %3955 = vmatprep.subr.bf16.mxu0 %v5133_v18 }
  0x82   : > { %3957 = vmatpush1.bf16.msra.mxu0 %v5136_v31 }
  0x83   : > { %3959 = vmatprep.subr.bf16.mxu0 %v5139_v34 }
  0x86   : > { %3961 = vmatpush1.bf16.msra.mxu0 %v5142_v44 }
  0x87   : > { %3963 = vmatprep.subr.bf16.mxu0 %v5145_v48 }
  0x8a   : > { %3965 = vmatpush1.bf16.msra.mxu0 %v5148_v61 }
  0x8b   : > { %3967 = vmatprep.subr.bf16.mxu0 %v5151_v62 }
  0x8e   : > { %3969 = vmatpush1.bf16.msra.mxu0 %v5154_v12 }
  0x8f   : > { %3971 = vmatprep.subr.bf16.mxu0 %v5157_v16 }
  0x92   : > { %3973 = vmatpush1.bf16.msra.mxu0 %v5160_v35  ;;  %v935_v35 = vld [vmem:[#allocation2 + $0x658] sm:$0xff] }
  0x93   : > { %3975 = vmatprep.subr.bf16.mxu0 %v5163_v36  ;;  %v930_v36 = vld [vmem:[#allocation2 + $0x630] sm:$0xff] }
  0x96   : > { %3977 = vmatpush1.bf16.msra.mxu0 %v5166_v55  ;;  %v600_v55 = vld [vmem:[#allocation2 + $0x150] sm:$0xff] }
  0x97   : > { %3979 = vmatprep.subr.bf16.mxu0 %v5169_v56  ;;  %v5184_v6 = vpack.c.bf16 %v600_v55, %v598_v14  ;;  %v602_v56 = vld [vmem:[#allocation2 + $0x160] sm:$0xff]  ;;  %v611_v14 = vld [vmem:[#allocation2 + $0x1a8] sm:$0xff]  ;;  %v613_v55 = vld [vmem:[#allocation2 + $0x1b8] sm:$0xff] }
  0x98   : > { %v5199_v2 = vpack.c.bf16 %v613_v55, %v611_v14 }
  0x99   : > { %6110 = vst [vmem:[#allocation39_spill] sm:$0xff] %v5184_v6 }
  0x9a   : > { %3981 = vmatpush1.bf16.msra.mxu0 %v5172_v23  ;;  %v604_v23 = vld [vmem:[#allocation2 + $0x170] sm:$0xff]  ;;  %6115 = vst [vmem:[#allocation44_spill] sm:$0xff] %v5199_v2 }
  0x9b   : > { %3983 = vmatprep.subr.bf16.mxu0 %v5175_v24  ;;  %v5190_v41 = vpack.c.bf16 %v604_v23, %v602_v56  ;;  %v606_v24 = vld [vmem:[#allocation2 + $0x180] sm:$0xff]  ;;  %v615_v56 = vld [vmem:[#allocation2 + $0x1c8] sm:$0xff]  ;;  %v617_v23 = vld [vmem:[#allocation2 + $0x1d8] sm:$0xff] }
  0x9c   : > { %v5205_v28 = vpack.c.bf16 %v617_v23, %v615_v56  ;;  %v693_v56 = vld [vmem:[%s5918_s2] sm:$0xff]  ;;  %v925_v23 = vld [vmem:[#allocation2 + $0x608] sm:$0xff] }
  0x9d   : > { %6112 = vst [vmem:[#allocation41_spill] sm:$0xff] %v5190_v41 }
  0x9e   : > { %3985 = vmatpush1.bf16.msra.mxu0 %v5178_v51  ;;  %v608_v51 = vld [vmem:[#allocation2 + $0x190] sm:$0xff]  ;;  %6117 = vst [vmem:[#allocation46_spill] sm:$0xff] %v5205_v28 }
  0x9f   : > { %3987 = vmatprep.subr.bf16.mxu0 %v5181_v54  ;;  %v5196_v63 = vpack.c.bf16 %v608_v51, %v606_v24  ;;  %v610_v54 = vld [vmem:[#allocation2 + $0x1a0] sm:$0xff]  ;;  %v619_v24 = vld [vmem:[#allocation2 + $0x1e8] sm:$0xff]  ;;  %v621_v51 = vld [vmem:[#allocation2 + $0x1f8] sm:$0xff] }
  0xa0   : > { %v5211_v55 = vpack.c.bf16 %v621_v51, %v619_v24  ;;  %v927_v24 = vld [vmem:[#allocation2 + $0x618] sm:$0xff] }
  0xa1   : > { %6114 = vst [vmem:[#allocation43_spill] sm:$0xff] %v5196_v63 }
  0xa2   : > { %3989 = vmatpush1.bf16.msra.mxu0 %v5184_v6  ;;  %v612_v6 = vld [vmem:[#allocation2 + $0x1b0] sm:$0xff]  ;;  %6119 = vst [vmem:[#allocation48_spill] sm:$0xff] %v5211_v55 }
  0xa3   : > { %3991 = vmatprep.subr.bf16.mxu0 %v5187_v11  ;;  %v5202_v25 = vpack.c.bf16 %v612_v6, %v610_v54  ;;  %v614_v11 = vld [vmem:[#allocation2 + $0x1c0] sm:$0xff]  ;;  %v6121_v6 = vmov 0.0  }
  0xa5   : > { %6116 = vst [vmem:[#allocation45_spill] sm:$0xff] %v5202_v25 }
  0xa6   : > { %3993 = vmatpush1.bf16.msra.mxu0 %v5190_v41  ;;  %v616_v41 = vld [vmem:[#allocation2 + $0x1d0] sm:$0xff] }
  0xa7   : > { %3995 = vmatprep.subr.bf16.mxu0 %v5193_v43  ;;  %v5208_v14 = vpack.c.bf16 %v616_v41, %v614_v11  ;;  %v618_v43 = vld [vmem:[#allocation2 + $0x1e0] sm:$0xff] }
  0xa9   : > { %6118 = vst [vmem:[#allocation47_spill] sm:$0xff] %v5208_v14 }
  0xaa   : > { %3997 = vmatpush1.bf16.msra.mxu0 %v5196_v63  ;;  %v620_v63 = vld [vmem:[#allocation2 + $0x1f0] sm:$0xff] }
  0xab   : > { %3999 = vmatprep.subr.bf16.mxu0 %v5199_v2  ;;  %v5214_v54 = vpack.c.bf16 %v620_v63, %v618_v43  ;;  %v3813_v43 = vld [vmem:[%s5918_s2 + $0x20] sm:$0xff]  ;;  %v3812_v63 = vld [vmem:[%s5918_s2 + $0x18] sm:$0xff] }
  0xad   : > { %6120 = vst [vmem:[#allocation49_spill] sm:$0xff] %v5214_v54 }
  0xae   : > { %4001 = vmatpush1.bf16.msra.mxu0 %v5202_v25  ;;  %v3816_v25 = vld [vmem:[%s5918_s2 + $0x28] sm:$0xff] }
  0xaf   : > { %4003 = vmatprep.subr.bf16.mxu0 %v5205_v28  ;;  %v929_v28 = vld [vmem:[#allocation2 + $0x628] sm:$0xff] }
  0xb2   : > { %4005 = vmatpush1.bf16.msra.mxu0 %v5208_v14  ;;  %v5240_v14 = vpack.c.bf16 %v927_v24, %v925_v23  ;;  %v3819_v23 = vld [vmem:[%s5918_s2 + $0x38] sm:$0xff]  ;;  %v928_v24 = vld [vmem:[#allocation2 + $0x620] sm:$0xff] }
  0xb3   : > { %4007 = vmatprep.subr.bf16.mxu0 %v5211_v55  ;;  %v926_v55 = vld [vmem:[#allocation2 + $0x610] sm:$0xff] }
  0xb6   : > { %4009 = vmatpush1.bf16.msra.mxu0 %v5214_v54  ;;  %v3810_v54 = vld [vmem:[%s5918_s2 + $0x10] sm:$0xff] }
  0xb9   : > { %687 = vmatmul.mubr.f32.vlgmr.msra.gmra.mrb[2].mxu0 %v5052_v45 }
  0xba   : > { %914 = vmatprep.mubr.f32.mxu0 %v6121_v6 }
 0x14c   : > { %v553_v11 = vpop.f32.mrb[0].mxu0 }
 0x14d   : > { %v555_v41 = vpop.f32.mrb[1].mxu0 }
 0x14e   : > { %774 = vmatprep.subr.mxu1 %v555_v41 }
 0x14f   : > { %775 = vmatpush1.msra.mxu1 %v553_v11 }
 0x150   : > { %3809 = vmatmul.mubr.msk.f32.vlgmr.msra.gmra.mrb[0].mxu1 %vm696_vm0, %v693_v56  ;;  %995 = vmatprep.subr.mxu1 %v5049_v42 }
 0x151   : > { %996 = vmatpush1.msra.mxu1 %v5052_v45  ;;  %1059 = vmatprep.mubr.f32.mxu1 %v6121_v6 }
 0x152   : > { %1069 = vmatprep.subr.mxu1 %v555_v41 }
 0x154   : > { %3814 = vmatmul.mubr.msk.f32.vlgmr.msra.gmra.mrb[2].mxu1 %vm696_vm0, %v3813_v43  ;;  %v924_v43 = vld [vmem:[#allocation2 + $0x600] sm:$0xff] }
 0x155   : > { %1070 = vmatpush1.msra.mxu1 %v553_v11  ;;  %1133 = vmatprep.mubr.f32.mxu1 %v6121_v6  ;;  %v5247_v2 = vpack.c.bf16 %v926_v55, %v924_v43  ;;  %v934_v43 = vld [vmem:[#allocation2 + $0x650] sm:$0xff] }
 0x15c   : > { %3815 = vmatmul.mubr.msk.f32.vlgmr.msra.gmra.mrb[2].mxu1 %vm696_vm0, %v3812_v63  ;;  %v931_v63 = vld [vmem:[#allocation2 + $0x638] sm:$0xff] }
 0x15d   : > { %1209 = vmatprep.mubr.f32.mxu1 %v6121_v6 }
 0x18c   : > { %v688_v51 = vpop.f32.mrb[2].mxu0 }
 0x18d   : > { %v690_v56 = vpop.f32.mrb[3].mxu0 }
 0x18e   : > { %850 = vmatprep.subr.mxu0 %v690_v56  ;;  %1145 = vmatprep.subr.mxu1 %v690_v56 }
 0x18f   : > { %851 = vmatpush1.msra.mxu0 %v688_v51  ;;  %1146 = vmatpush1.msra.mxu1 %v688_v51 }
 0x190   : > { %3811 = vmatmul.mubr.msk.f32.vlgmr.msra.gmra.mrb[4].mxu0 %vm696_vm0, %v3810_v54  ;;  %1296 = vmatprep.subr.mxu0 %v5049_v42  ;;  %v5255_v42 = vpack.c.bf16 %v931_v63, %v929_v28  ;;  %v933_v54 = vld [vmem:[#allocation2 + $0x648] sm:$0xff]  ;;  %v939_v63 = vld [vmem:[#allocation2 + $0x678] sm:$0xff] }
 0x191   : > { %1297 = vmatpush1.msra.mxu0 %v5052_v45  ;;  %1360 = vmatprep.mubr.f32.mxu0 %v6121_v6  ;;  %v5260_v45 = vpack.c.bf16 %v930_v36, %v928_v24  ;;  %v5263_v55 = vpack.c.bf16 %v935_v35, %v933_v54  ;;  %v937_v28 = vld [vmem:[#allocation2 + $0x668] sm:$0xff]  ;;  %v3818_v36 = vld [vmem:[%s5918_s2 + $0x30] sm:$0xff] }
 0x192   : > { %1370 = vmatprep.subr.mxu0 %v555_v41  ;;  %4011 = vmatprep.subr.bf16.mxu1 %v5240_v14  ;;  %v932_v41 = vld [vmem:[#allocation2 + $0x640] sm:$0xff]  ;;  %v938_v35 = vld [vmem:[#allocation2 + $0x670] sm:$0xff]  ;;  %v941_v24 = vld [vmem:[#allocation2 + $0x688] sm:$0xff] }
 0x193   : > { %3817 = vmatmul.mubr.msk.f32.vlgmr.msra.gmra.mrb[2].mxu1 %vm696_vm0, %v3816_v25  ;;  %6122 = vst [vmem:[#allocation50_spill] sm:$0xff] %v5260_v45  ;;  %6123 = vst [vmem:[#allocation51_spill] sm:$0xff] %v5263_v55  ;;  %v5267_v25 = vpack.c.bf16 %v934_v43, %v932_v41  ;;  %v940_v43 = vld [vmem:[#allocation2 + $0x680] sm:$0xff] }
 0x194   : > { %3820 = vmatmul.mubr.msk.f32.vlgmr.msra.gmra.mrb[6].mxu0 %vm696_vm0, %v3819_v23  ;;  %4013 = vmatpush1.bf16.msra.mxu1 %v5247_v2  ;;  %v5273_v23 = vpack.c.bf16 %v939_v63, %v937_v28  ;;  %v947_v28 = vld [vmem:[#allocation2 + $0x6b8] sm:$0xff] }
 0x195   : > { %1371 = vmatpush1.msra.mxu0 %v553_v11  ;;  %1434 = vmatprep.mubr.f32.mxu0 %v6121_v6  ;;  %v936_v11 = vld [vmem:[#allocation2 + $0x660] sm:$0xff] }
 0x196   : > { %1446 = vmatprep.subr.mxu0 %v690_v56  ;;  %4015 = vmatprep.subr.bf16.mxu1 %v5255_v42  ;;  %v943_v56 = vld [vmem:[#allocation2 + $0x698] sm:$0xff]  ;;  %v5277_v54 = vpack.c.bf16 %v938_v35, %v936_v11  ;;  %v944_v11 = vld [vmem:[#allocation2 + $0x6a0] sm:$0xff]  ;;  %v946_v35 = vld [vmem:[#allocation2 + $0x6b0] sm:$0xff] }
 0x197   : > { %v5280_v41 = vpack.c.bf16 %v943_v56, %v941_v24  ;;  %v949_v24 = vld [vmem:[#allocation2 + $0x6c8] sm:$0xff]  ;;  %v951_v56 = vld [vmem:[#allocation2 + $0x6d8] sm:$0xff] }
 0x198   : > { %4017 = vmatpush1.bf16.msra.mxu1 %v5260_v45  ;;  %6124 = vst [vmem:[#allocation52_spill] sm:$0xff] %v5277_v54  ;;  %v942_v45 = vld [vmem:[#allocation2 + $0x690] sm:$0xff] }
 0x199   : > { %4019 = vmatprep.subr.bf16.mxu1 %v5263_v55  ;;  %6125 = vst [vmem:[#allocation53_spill] sm:$0xff] %v5280_v41  ;;  %v945_v55 = vld [vmem:[#allocation2 + $0x6a8] sm:$0xff]  ;;  %v5285_v63 = vpack.c.bf16 %v942_v45, %v940_v43  ;;  %v5298_v45 = vpack.c.bf16 %v951_v56, %v949_v24  ;;  %v948_v43 = vld [vmem:[#allocation2 + $0x6c0] sm:$0xff]  ;;  %v959_v56 = vld [vmem:[#allocation2 + $0x718] sm:$0xff] }
 0x19a   : > { %v957_v24 = vld [vmem:[#allocation2 + $0x708] sm:$0xff] }
 0x19b   : > { %6126 = vst [vmem:[#allocation54_spill] sm:$0xff] %v5298_v45 }
 0x19c   : > { %3821 = vmatmul.mubr.msk.f32.vlgmr.msra.gmra.mrb[6].mxu0 %vm696_vm0, %v3818_v36  ;;  %4021 = vmatpush1.bf16.msra.mxu1 %v5267_v25  ;;  %v5291_v36 = vpack.c.bf16 %v947_v28, %v945_v55  ;;  %v953_v55 = vld [vmem:[#allocation2 + $0x6e8] sm:$0xff]  ;;  %v955_v28 = vld [vmem:[#allocation2 + $0x6f8] sm:$0xff] }
 0x19d   : > { %1447 = vmatpush1.msra.mxu0 %v688_v51  ;;  %1510 = vmatprep.mubr.f32.mxu0 %v6121_v6  ;;  %v3822_v51 = vld [vmem:[%s5918_s2 + $0x40] sm:$0xff] }
 0x19e   : > { %4023 = vmatprep.subr.bf16.mxu1 %v5273_v23  ;;  %4139 = vmatprep.subr.bf16.mxu0 %v5004_v3  ;;  %v5295_v3 = vpack.c.bf16 %v946_v35, %v944_v11  ;;  %v952_v11 = vld [vmem:[#allocation2 + $0x6e0] sm:$0xff]  ;;  %v954_v35 = vld [vmem:[#allocation2 + $0x6f0] sm:$0xff] }
 0x1a0   : > { %4025 = vmatpush1.bf16.msra.mxu1 %v5277_v54  ;;  %v950_v54 = vld [vmem:[#allocation2 + $0x6d0] sm:$0xff] }
 0x1a1   : > { %4027 = vmatprep.subr.bf16.mxu1 %v5280_v41  ;;  %v5303_v41 = vpack.c.bf16 %v950_v54, %v948_v43  ;;  %v5314_v54 = vpack.c.bf16 %v959_v56, %v957_v24  ;;  %v956_v43 = vld [vmem:[#allocation2 + $0x700] sm:$0xff]  ;;  %v965_v24 = vld [vmem:[#allocation2 + $0x748] sm:$0xff]  ;;  %v967_v56 = vld [vmem:[#allocation2 + $0x758] sm:$0xff] }
 0x1a3   : > { %6128 = vst [vmem:[#allocation56_spill] sm:$0xff] %v5314_v54 }
 0x1a4   : > { %3823 = vmatmul.mubr.msk.f32.vlgmr.msra.gmra.mrb[6].mxu0 %vm696_vm0, %v3822_v51  ;;  %4029 = vmatpush1.bf16.msra.mxu1 %v5285_v63  ;;  %v5306_v51 = vpack.c.bf16 %v955_v28, %v953_v55  ;;  %v961_v55 = vld [vmem:[#allocation2 + $0x728] sm:$0xff]  ;;  %v963_v28 = vld [vmem:[#allocation2 + $0x738] sm:$0xff] }
 0x1a5   : > { %4031 = vmatprep.subr.bf16.mxu1 %v5291_v36  ;;  %4141 = vmatpush1.bf16.msra.mxu0 %v5006_v7  ;;  %v5311_v7 = vpack.c.bf16 %v954_v35, %v952_v11  ;;  %v5322_v11 = vpack.c.bf16 %v963_v28, %v961_v55  ;;  %v960_v35 = vld [vmem:[#allocation2 + $0x720] sm:$0xff]  ;;  %v969_v55 = vld [vmem:[#allocation2 + $0x768] sm:$0xff]  ;;  %v971_v28 = vld [vmem:[#allocation2 + $0x778] sm:$0xff] }
 0x1a6   : > { %4143 = vmatprep.subr.bf16.mxu0 %v5008_v8  ;;  %6127 = vst [vmem:[#allocation55_spill] sm:$0xff] %v5306_v51 }
 0x1a7   : > { %6129 = vst [vmem:[#allocation57_spill] sm:$0xff] %v5322_v11 }
 0x1a8   : > { %4033 = vmatpush1.bf16.msra.mxu1 %v5295_v3 }
 0x1a9   : > { %4035 = vmatprep.subr.bf16.mxu1 %v5298_v45  ;;  %4145 = vmatpush1.bf16.msra.mxu0 %v5012_v13  ;;  %v958_v45 = vld [vmem:[#allocation2 + $0x710] sm:$0xff] }
 0x1aa   : > { %4147 = vmatprep.subr.bf16.mxu0 %v5017_v15  ;;  %v5319_v13 = vpack.c.bf16 %v958_v45, %v956_v43  ;;  %v5330_v45 = vpack.c.bf16 %v967_v56, %v965_v24  ;;  %v964_v43 = vld [vmem:[#allocation2 + $0x740] sm:$0xff]  ;;  %v973_v24 = vld [vmem:[#allocation2 + $0x788] sm:$0xff]  ;;  %v975_v56 = vld [vmem:[#allocation2 + $0x798] sm:$0xff] }
 0x1ac   : > { %4037 = vmatpush1.bf16.msra.mxu1 %v5303_v41  ;;  %6130 = vst [vmem:[#allocation58_spill] sm:$0xff] %v5330_v45 }
 0x1ad   : > { %4039 = vmatprep.subr.bf16.mxu1 %v5306_v51  ;;  %4149 = vmatpush1.bf16.msra.mxu0 %v5020_v20  ;;  %v962_v51 = vld [vmem:[#allocation2 + $0x730] sm:$0xff] }
 0x1ae   : > { %4151 = vmatprep.subr.bf16.mxu0 %v5023_v21  ;;  %v5327_v20 = vpack.c.bf16 %v962_v51, %v960_v35  ;;  %v5338_v51 = vpack.c.bf16 %v971_v28, %v969_v55  ;;  %v968_v35 = vld [vmem:[#allocation2 + $0x760] sm:$0xff]  ;;  %v977_v55 = vld [vmem:[#allocation2 + $0x7a8] sm:$0xff]  ;;  %v979_v28 = vld [vmem:[#allocation2 + $0x7b8] sm:$0xff] }
 0x1b0   : > { %4041 = vmatpush1.bf16.msra.mxu1 %v5311_v7  ;;  %6131 = vst [vmem:[#allocation59_spill] sm:$0xff] %v5338_v51 }
 0x1b1   : > { %4043 = vmatprep.subr.bf16.mxu1 %v5314_v54  ;;  %4153 = vmatpush1.bf16.msra.mxu0 %v5028_v26  ;;  %v966_v54 = vld [vmem:[#allocation2 + $0x750] sm:$0xff] }
 0x1b2   : > { %4155 = vmatprep.subr.bf16.mxu0 %v5031_v27  ;;  %v5335_v26 = vpack.c.bf16 %v966_v54, %v964_v43  ;;  %v5346_v54 = vpack.c.bf16 %v975_v56, %v973_v24  ;;  %v972_v43 = vld [vmem:[#allocation2 + $0x780] sm:$0xff]  ;;  %v981_v24 = vld [vmem:[#allocation2 + $0x7c8] sm:$0xff]  ;;  %v983_v56 = vld [vmem:[#allocation2 + $0x7d8] sm:$0xff] }
 0x1b4   : > { %4045 = vmatpush1.bf16.msra.mxu1 %v5319_v13  ;;  %6132 = vst [vmem:[#allocation60_spill] sm:$0xff] %v5346_v54 }
 0x1b5   : > { %4047 = vmatprep.subr.bf16.mxu1 %v5322_v11  ;;  %4157 = vmatpush1.bf16.msra.mxu0 %v5035_v32  ;;  %v970_v11 = vld [vmem:[#allocation2 + $0x770] sm:$0xff] }
 0x1b6   : > { %4159 = vmatprep.subr.bf16.mxu0 %v5038_v33  ;;  %v5343_v32 = vpack.c.bf16 %v970_v11, %v968_v35  ;;  %v5354_v11 = vpack.c.bf16 %v979_v28, %v977_v55  ;;  %v976_v35 = vld [vmem:[#allocation2 + $0x7a0] sm:$0xff] }
 0x1b8   : > { %4049 = vmatpush1.bf16.msra.mxu1 %v5327_v20 }
 0x1b9   : > { %4051 = vmatprep.subr.bf16.mxu1 %v5330_v45  ;;  %4161 = vmatpush1.bf16.msra.mxu0 %v5044_v38  ;;  %v974_v45 = vld [vmem:[#allocation2 + $0x790] sm:$0xff] }
 0x1ba   : > { %4163 = vmatprep.subr.bf16.mxu0 %v5047_v39  ;;  %v5351_v38 = vpack.c.bf16 %v974_v45, %v972_v43  ;;  %v5362_v45 = vpack.c.bf16 %v983_v56, %v981_v24  ;;  %v980_v43 = vld [vmem:[#allocation2 + $0x7c0] sm:$0xff]  ;;  %v986_v24 = vld [vmem:[#allocation2 + $0x7f0] sm:$0xff] }
 0x1bc   : > { %4053 = vmatpush1.bf16.msra.mxu1 %v5335_v26 }
 0x1bd   : > { %4055 = vmatprep.subr.bf16.mxu1 %v5338_v51  ;;  %4165 = vmatpush1.bf16.msra.mxu0 %v5057_v46  ;;  %v978_v51 = vld [vmem:[#allocation2 + $0x7b0] sm:$0xff] }
 0x1be   : > { %4167 = vmatprep.subr.bf16.mxu0 %v5060_v47  ;;  %v5359_v46 = vpack.c.bf16 %v978_v51, %v976_v35  ;;  %v985_v51 = vld [vmem:[#allocation2 + $0x7e8] sm:$0xff]  ;;  %v984_v35 = vld [vmem:[#allocation2 + $0x7e0] sm:$0xff] }
 0x1bf   : > { %v5387_v56 = vpack.c.bf16 %v986_v24, %v984_v35  ;;  %v2642_v35 = vld [vmem:[%s5921_s5] sm:$0xf] }
 0x1c0   : > { %4057 = vmatpush1.bf16.msra.mxu1 %v5343_v32  ;;  %v1520_v24 = vld [vmem:[#allocation2 + $0x400] sm:$0xff] }
 0x1c1   : > { %4059 = vmatprep.subr.bf16.mxu1 %v5346_v54  ;;  %4169 = vmatpush1.bf16.msra.mxu0 %v5063_v52  ;;  %v982_v54 = vld [vmem:[#allocation2 + $0x7d0] sm:$0xff]  ;;  %6133 = vst [vmem:[#allocation61_spill] sm:$0xff] %v5387_v56 }
 0x1c2   : > { %4171 = vmatprep.subr.bf16.mxu0 %v5066_v53  ;;  %v5367_v55 = vpack.c.bf16 %v982_v54, %v980_v43  ;;  %v987_v54 = vld [vmem:[#allocation2 + $0x7f8] sm:$0xff]  ;;  %v1521_v43 = vld [vmem:[#allocation2 + $0x408] sm:$0xff] }
 0x1c3   : > { %v5384_v28 = vpack.c.bf16 %v987_v54, %v985_v51  ;;  %v1657_v51 = vld [vmem:[%s5919_s3] sm:$0xff]  ;;  %v4864_v54 = vmov 0  }
 0x1c4   : > { %4061 = vmatpush1.bf16.msra.mxu1 %v5351_v38  ;;  %4752 = vset.pattern.permute.xlu0 %v4864_v54 }
 0x1c5   : > { %4063 = vmatprep.subr.bf16.mxu1 %v5354_v11  ;;  %4173 = vmatpush1.bf16.msra.mxu0 %v5069_v58 }
 0x1c6   : > { %4175 = vmatprep.subr.bf16.mxu0 %v5072_v59  ;;  %4753 = vset.pattern.permute.xlu1 %v4864_v54  ;;  %v1526_v54 = vld [vmem:[#allocation2 + $0x430] sm:$0xff] }
 0x1c7   : > { %1660 = vperm.xlu0 %4752, %v1657_v51   ;;  %v1529_v51 = vld [vmem:[#allocation2 + $0x448] sm:$0xff] }
 0x1c8   : > { %4065 = vmatpush1.bf16.msra.mxu1 %v5359_v46 }
 0x1c9   : > { %4067 = vmatprep.subr.bf16.mxu1 %v5362_v45  ;;  %4177 = vmatpush1.bf16.msra.mxu0 %v5075_v0 }
 0x1ca   : > { %4179 = vmatprep.subr.bf16.mxu0 %v5078_v1 }
 0x1cb   : > { %2645 = vperm.xlu0 %4752, %v2642_v35  }
 0x1cc   : > { %4069 = vmatpush1.bf16.msra.mxu1 %v5367_v55 }
 0x1cd   : > { %4181 = vmatpush1.bf16.msra.mxu0 %v5081_v9  ;;  %4071 = vmatprep.subr.bf16.mxu1 %v5384_v28 }
 0x1ce   : > { %4183 = vmatprep.subr.bf16.mxu0 %v5084_v10  ;;  %v1531_v10 = vld [vmem:[#allocation2 + $0x458] sm:$0xff] }
 0x1cf   : > { %v5408_v9 = vpack.c.bf16 %v1531_v10, %v1529_v51  ;;  %v1538_v51 = vld [vmem:[#allocation2 + $0x490] sm:$0xff] }
 0x1d0   : > { %4073 = vmatpush1.bf16.msra.mxu1 %v5387_v56  ;;  %v1524_v56 = vld [vmem:[#allocation2 + $0x420] sm:$0xff] }
 0x1d1   : > { %4185 = vmatpush1.bf16.msra.mxu0 %v5090_v19  ;;  %v5405_v35 = vpack.c.bf16 %v1526_v54, %v1524_v56  ;;  %6137 = vst [vmem:[#allocation65_spill] sm:$0xff] %v5408_v9  ;;  %v1537_v56 = vld [vmem:[#allocation2 + $0x488] sm:$0xff]  ;;  %v1536_v54 = vld [vmem:[#allocation2 + $0x480] sm:$0xff] }
 0x1d2   : > { %4187 = vmatprep.subr.bf16.mxu0 %v5094_v22 }
 0x1d3   : > { %6136 = vst [vmem:[#allocation64_spill] sm:$0xff] %v5405_v35 }
 0x1d5   : > { %4189 = vmatpush1.bf16.msra.mxu0 %v5098_v29 }
 0x1d6   : > { %4191 = vmatprep.subr.bf16.mxu0 %v5101_v30 }
 0x1d9   : > { %4193 = vmatpush1.bf16.msra.mxu0 %v5104_v37  ;;  %v1527_v37 = vld [vmem:[#allocation2 + $0x438] sm:$0xff] }
 0x1da   : > { %4195 = vmatprep.subr.bf16.mxu0 %v5107_v40 }
 0x1dd   : > { %4197 = vmatpush1.bf16.msra.mxu0 %v5110_v49  ;;  %v1523_v49 = vld [vmem:[#allocation2 + $0x418] sm:$0xff] }
 0x1de   : > { %4199 = vmatprep.subr.bf16.mxu0 %v5113_v50  ;;  %v5391_v40 = vpack.c.bf16 %v1523_v49, %v1521_v43  ;;  %v1522_v49 = vld [vmem:[#allocation2 + $0x410] sm:$0xff] }
 0x1df   : > { %v5400_v19 = vpack.c.bf16 %v1522_v49, %v1520_v24  ;;  %v1535_v24 = vld [vmem:[#allocation2 + $0x478] sm:$0xff] }
 0x1e0   : > { %6134 = vst [vmem:[#allocation62_spill] sm:$0xff] %v5391_v40  ;;  %4075 = vmatprep.subr.bf16.mxu1 %v5391_v40  ;;  %v1539_v49 = vld [vmem:[#allocation2 + $0x498] sm:$0xff] }
 0x1e1   : > { %4201 = vmatpush1.bf16.msra.mxu0 %v5116_v57 }
 0x1e2   : > { %4203 = vmatprep.subr.bf16.mxu0 %v5119_v60  ;;  %v1525_v60 = vld [vmem:[#allocation2 + $0x428] sm:$0xff] }
 0x1e3   : > { %v5402_v40 = vpack.c.bf16 %v1527_v37, %v1525_v60  ;;  %v1534_v60 = vld [vmem:[#allocation2 + $0x470] sm:$0xff] }
 0x1e5   : > { %6135 = vst [vmem:[#allocation63_spill] sm:$0xff] %v5402_v40 }
 0x223   : > { %v840_v50 = vpop.f32.mrb[0].mxu1 }
 0x224   : > { %v842_v57 = vpop.f32.mrb[1].mxu1 }
 0x263   : > { %v916_v43 = vpop.f32.mrb[4].mxu0 }
 0x264   : > { %v4650_v30 = vadd.f32 %v916_v43, %v840_v50  ;;  %v918_v29 = vpop.f32.mrb[5].mxu0  ;;  %v1528_v50 = vld [vmem:[#allocation2 + $0x440] sm:$0xff]  ;;  %v5420_v43 = vpack.c.bf16 %v1539_v49, %v1537_v56 }
 0x265   : > { %v4651_v22 = vadd.f32 %v918_v29, %v842_v57  ;;  %v1530_v29 = vld [vmem:[#allocation2 + $0x450] sm:$0xff]  ;;  %v1533_v57 = vld [vmem:[#allocation2 + $0x468] sm:$0xff] }
 0x266   : > { %v5411_v37 = vpack.c.bf16 %v1530_v29, %v1528_v50  ;;  %6141 = vst [vmem:[#allocation69_spill] sm:$0xff] %v5420_v43  ;;  %v1541_v50 = vld [vmem:[#allocation2 + $0x4a8] sm:$0xff]  ;;  %v1543_v29 = vld [vmem:[#allocation2 + $0x4b8] sm:$0xff] }
 0x267   : > { %1282 = vmatprep.mubr.f32.mxu1 %v4651_v22  ;;  %v5414_v22 = vpack.c.bf16 %v1535_v24, %v1533_v57  ;;  %v5423_v57 = vpack.c.bf16 %v1538_v51, %v1536_v54  ;;  %v5426_v24 = vpack.c.bf16 %v1543_v29, %v1541_v50  ;;  %v1544_v51 = vld [vmem:[#allocation2 + $0x4c0] sm:$0xff]  ;;  %v1549_v50 = vld [vmem:[#allocation2 + $0x4e8] sm:$0xff]  ;;  %v1551_v29 = vld [vmem:[#allocation2 + $0x4f8] sm:$0xff] }
 0x268   : > { %1283 = vmatmul.mubr.f32.vlgmr.msra.gmra.mrb[2].mxu1 %v4650_v30  ;;  %6138 = vst [vmem:[#allocation66_spill] sm:$0xff] %v5411_v37  ;;  %v1532_v30 = vld [vmem:[#allocation2 + $0x460] sm:$0xff] }
 0x269   : > { %4077 = vmatpush1.bf16.msra.mxu1 %v5400_v19  ;;  %6139 = vst [vmem:[#allocation67_spill] sm:$0xff] %v5414_v22  ;;  %v5417_v10 = vpack.c.bf16 %v1534_v60, %v1532_v30  ;;  %6142 = vst [vmem:[#allocation70_spill] sm:$0xff] %v5423_v57  ;;  %v1545_v30 = vld [vmem:[#allocation2 + $0x4c8] sm:$0xff]  ;;  %v1547_v60 = vld [vmem:[#allocation2 + $0x4d8] sm:$0xff] }
 0x26a   : > { %4079 = vmatprep.subr.bf16.mxu1 %v5402_v40  ;;  %6143 = vst [vmem:[#allocation71_spill] sm:$0xff] %v5426_v24  ;;  %v5434_v54 = vpack.c.bf16 %v1547_v60, %v1545_v30 }
 0x26b   : > { %6140 = vst [vmem:[#allocation68_spill] sm:$0xff] %v5417_v10 }
 0x26c   : > { %6145 = vst [vmem:[#allocation73_spill] sm:$0xff] %v5434_v54 }
 0x26d   : > { %4081 = vmatpush1.bf16.msra.mxu1 %v5405_v35 }
 0x26e   : > { %4083 = vmatprep.subr.bf16.mxu1 %v5408_v9  ;;  %v1540_v9 = vld [vmem:[#allocation2 + $0x4a0] sm:$0xff] }
 0x271   : > { %4085 = vmatpush1.bf16.msra.mxu1 %v5411_v37  ;;  %v1542_v37 = vld [vmem:[#allocation2 + $0x4b0] sm:$0xff] }
 0x272   : > { %4087 = vmatprep.subr.bf16.mxu1 %v5414_v22  ;;  %v5431_v49 = vpack.c.bf16 %v1542_v37, %v1540_v9  ;;  %v5440_v22 = vpack.c.bf16 %v1551_v29, %v1549_v50  ;;  %v1550_v9 = vld [vmem:[#allocation2 + $0x4f0] sm:$0xff]  ;;  %v1553_v37 = vld [vmem:[#allocation2 + $0x508] sm:$0xff] }
 0x274   : > { %6144 = vst [vmem:[#allocation72_spill] sm:$0xff] %v5431_v49  ;;  %6147 = vst [vmem:[#allocation75_spill] sm:$0xff] %v5440_v22 }
 0x275   : > { %4089 = vmatpush1.bf16.msra.mxu1 %v5417_v10 }
 0x276   : > { %4091 = vmatprep.subr.bf16.mxu1 %v5420_v43  ;;  %v1546_v43 = vld [vmem:[#allocation2 + $0x4d0] sm:$0xff] }
 0x277   : > { %v5428_v35 = vpop.f32.mrb[6].mxu0  ;;  %v5437_v10 = vpack.c.bf16 %v1546_v43, %v1544_v51  ;;  %v1557_v43 = vld [vmem:[#allocation2 + $0x528] sm:$0xff]  ;;  %v1559_v51 = vld [vmem:[#allocation2 + $0x538] sm:$0xff] }
 0x278   : > { %v1514_v56 = vpop.f32.mrb[7].mxu0  ;;  %v5452_v29 = vpack.c.bf16 %v1559_v51, %v1557_v43 }
 0x279   : > { %4093 = vmatpush1.bf16.msra.mxu1 %v5423_v57  ;;  %1648 = vmatprep.mubr.f32.mxu1 %v1514_v56  ;;  %6146 = vst [vmem:[#allocation74_spill] sm:$0xff] %v5437_v10  ;;  %v1548_v57 = vld [vmem:[#allocation2 + $0x4e0] sm:$0xff]  ;;  %v1555_v56 = vld [vmem:[#allocation2 + $0x518] sm:$0xff] }
 0x27a   : > { %4095 = vmatprep.subr.bf16.mxu1 %v5426_v24  ;;  %v5443_v30 = vpack.c.bf16 %v1550_v9, %v1548_v57  ;;  %v5446_v60 = vpack.c.bf16 %v1555_v56, %v1553_v37  ;;  %v1552_v24 = vld [vmem:[#allocation2 + $0x500] sm:$0xff]  ;;  %6151 = vst [vmem:[#allocation79_spill] sm:$0xff] %v5452_v29  ;;  %v1561_v57 = vld [vmem:[#allocation2 + $0x548] sm:$0xff]  ;;  %v1563_v9 = vld [vmem:[#allocation2 + $0x558] sm:$0xff] }
 0x27b   : > { %v5458_v56 = vpack.c.bf16 %v1563_v9, %v1561_v57 }
 0x27c   : > { %6148 = vst [vmem:[#allocation76_spill] sm:$0xff] %v5443_v30  ;;  %6149 = vst [vmem:[#allocation77_spill] sm:$0xff] %v5446_v60 }
 0x27d   : > { %4097 = vmatpush1.bf16.msra.mxu1 %v5431_v49  ;;  %v1554_v49 = vld [vmem:[#allocation2 + $0x510] sm:$0xff]  ;;  %6153 = vst [vmem:[#allocation81_spill] sm:$0xff] %v5458_v56 }
 0x27e   : > { %4099 = vmatprep.subr.bf16.mxu1 %v5434_v54  ;;  %v5449_v50 = vpack.c.bf16 %v1554_v49, %v1552_v24  ;;  %v1556_v54 = vld [vmem:[#allocation2 + $0x520] sm:$0xff]  ;;  %v1565_v24 = vld [vmem:[#allocation2 + $0x568] sm:$0xff]  ;;  %v1567_v49 = vld [vmem:[#allocation2 + $0x578] sm:$0xff] }
 0x27f   : > { %v5464_v51 = vpack.c.bf16 %v1567_v49, %v1565_v24 }
 0x280   : > { %6150 = vst [vmem:[#allocation78_spill] sm:$0xff] %v5449_v50 }
 0x281   : > { %4101 = vmatpush1.bf16.msra.mxu1 %v5437_v10  ;;  %v1558_v10 = vld [vmem:[#allocation2 + $0x530] sm:$0xff]  ;;  %6155 = vst [vmem:[#allocation83_spill] sm:$0xff] %v5464_v51 }
 0x282   : > { %4103 = vmatprep.subr.bf16.mxu1 %v5440_v22  ;;  %v5455_v37 = vpack.c.bf16 %v1558_v10, %v1556_v54  ;;  %v1560_v22 = vld [vmem:[#allocation2 + $0x540] sm:$0xff]  ;;  %v1569_v10 = vld [vmem:[#allocation2 + $0x588] sm:$0xff]  ;;  %v1571_v54 = vld [vmem:[#allocation2 + $0x598] sm:$0xff] }
 0x283   : > { %v5470_v9 = vpack.c.bf16 %v1571_v54, %v1569_v10 }
 0x284   : > { %6152 = vst [vmem:[#allocation80_spill] sm:$0xff] %v5455_v37 }
 0x285   : > { %4105 = vmatpush1.bf16.msra.mxu1 %v5443_v30  ;;  %v1562_v30 = vld [vmem:[#allocation2 + $0x550] sm:$0xff]  ;;  %6157 = vst [vmem:[#allocation85_spill] sm:$0xff] %v5470_v9 }
 0x286   : > { %4107 = vmatprep.subr.bf16.mxu1 %v5446_v60  ;;  %v5461_v43 = vpack.c.bf16 %v1562_v30, %v1560_v22  ;;  %v1564_v60 = vld [vmem:[#allocation2 + $0x560] sm:$0xff]  ;;  %v1573_v22 = vld [vmem:[#allocation2 + $0x5a8] sm:$0xff]  ;;  %v1575_v30 = vld [vmem:[#allocation2 + $0x5b8] sm:$0xff] }
 0x287   : > { %v5476_v49 = vpack.c.bf16 %v1575_v30, %v1573_v22 }
 0x288   : > { %6154 = vst [vmem:[#allocation82_spill] sm:$0xff] %v5461_v43 }
 0x289   : > { %4109 = vmatpush1.bf16.msra.mxu1 %v5449_v50  ;;  %v1566_v50 = vld [vmem:[#allocation2 + $0x570] sm:$0xff]  ;;  %6159 = vst [vmem:[#allocation87_spill] sm:$0xff] %v5476_v49 }
 0x28a   : > { %4111 = vmatprep.subr.bf16.mxu1 %v5452_v29  ;;  %v5467_v57 = vpack.c.bf16 %v1566_v50, %v1564_v60  ;;  %v1568_v29 = vld [vmem:[#allocation2 + $0x580] sm:$0xff]  ;;  %v1577_v60 = vld [vmem:[#allocation2 + $0x5c8] sm:$0xff]  ;;  %v1579_v50 = vld [vmem:[#allocation2 + $0x5d8] sm:$0xff] }
 0x28b   : > { %v5482_v54 = vpack.c.bf16 %v1579_v50, %v1577_v60 }
 0x28c   : > { %6156 = vst [vmem:[#allocation84_spill] sm:$0xff] %v5467_v57 }
 0x28d   : > { %4113 = vmatpush1.bf16.msra.mxu1 %v5455_v37  ;;  %v1570_v37 = vld [vmem:[#allocation2 + $0x590] sm:$0xff]  ;;  %6161 = vst [vmem:[#allocation89_spill] sm:$0xff] %v5482_v54 }
 0x28e   : > { %4115 = vmatprep.subr.bf16.mxu1 %v5458_v56  ;;  %v5473_v24 = vpack.c.bf16 %v1570_v37, %v1568_v29  ;;  %v1572_v56 = vld [vmem:[#allocation2 + $0x5a0] sm:$0xff]  ;;  %v1581_v29 = vld [vmem:[#allocation2 + $0x5e8] sm:$0xff]  ;;  %v1583_v37 = vld [vmem:[#allocation2 + $0x5f8] sm:$0xff] }
 0x28f   : > { %v5488_v30 = vpack.c.bf16 %v1583_v37, %v1581_v29 }
 0x290   : > { %6158 = vst [vmem:[#allocation86_spill] sm:$0xff] %v5473_v24 }
 0x291   : > { %4117 = vmatpush1.bf16.msra.mxu1 %v5461_v43  ;;  %v1574_v43 = vld [vmem:[#allocation2 + $0x5b0] sm:$0xff]  ;;  %6163 = vst [vmem:[#allocation91_spill] sm:$0xff] %v5488_v30 }
 0x292   : > { %4119 = vmatprep.subr.bf16.mxu1 %v5464_v51  ;;  %v5479_v10 = vpack.c.bf16 %v1574_v43, %v1572_v56  ;;  %v1576_v51 = vld [vmem:[#allocation2 + $0x5c0] sm:$0xff]  ;;  %v1661_v43 = vpop.permute.xlu0 %1660 }
 0x294   : > { %6160 = vst [vmem:[#allocation88_spill] sm:$0xff] %v5479_v10 }
 0x295   : > { %4121 = vmatpush1.bf16.msra.mxu1 %v5467_v57  ;;  %v1578_v57 = vld [vmem:[#allocation2 + $0x5d0] sm:$0xff] }
 0x296   : > { %4123 = vmatprep.subr.bf16.mxu1 %v5470_v9  ;;  %v5485_v22 = vpack.c.bf16 %v1578_v57, %v1576_v51  ;;  %v1580_v9 = vld [vmem:[#allocation2 + $0x5e0] sm:$0xff] }
 0x298   : > { %6162 = vst [vmem:[#allocation90_spill] sm:$0xff] %v5485_v22 }
 0x299   : > { %4125 = vmatpush1.bf16.msra.mxu1 %v5473_v24  ;;  %v1582_v24 = vld [vmem:[#allocation2 + $0x5f0] sm:$0xff] }
 0x29a   : > { %4127 = vmatprep.subr.bf16.mxu1 %v5476_v49  ;;  %v5491_v56 = vpack.c.bf16 %v1582_v24, %v1580_v9  ;;  %v6166_v9 = vld [vmem:[#allocation32_spill] sm:$0xff]  ;;  %v6167_v24 = vld [vmem:[#allocation33_spill] sm:$0xff] }
 0x29c   : > { %6164 = vst [vmem:[#allocation92_spill] sm:$0xff] %v5491_v56 }
 0x29d   : > { %4129 = vmatpush1.bf16.msra.mxu1 %v5479_v10 }
 0x29e   : > { %4131 = vmatprep.subr.bf16.mxu1 %v5482_v54 }
 0x2a1   : > { %4133 = vmatpush1.bf16.msra.mxu1 %v5485_v22 }
 0x2a2   : > { %4135 = vmatprep.subr.bf16.mxu1 %v5488_v30 }
 0x2a5   : > { %4137 = vmatpush1.bf16.msra.mxu1 %v5491_v56 }
 0x2a8   : > { %1649 = vmatmul.mubr.f32.vlgmr.msra.gmra.mrb[2].mxu1 %v5428_v35  ;;  %v6165_v35 = vld [vmem:[#allocation31_spill] sm:$0xff] }
 0x2a9   : > { %1879 = vmatprep.mubr.f32.mxu1 %v6121_v6 }
 0x37b   : > { %v1650_v51 = vpop.f32.mrb[2].mxu1 }
 0x37c   : > { %v1663_v57 = vadd.f32 %v1661_v43, %v1650_v51  ;;  %v1652_v60 = vpop.f32.mrb[3].mxu1  ;;  %v6169_v51 = vld [vmem:[#allocation35_spill] sm:$0xff] }
 0x37d   : > { %v1664_v50 = vadd.f32 %v1661_v43, %v1652_v60  ;;  %v6168_v43 = vld [vmem:[#allocation34_spill] sm:$0xff]  ;;  %v6171_v60 = vld [vmem:[#allocation37_spill] sm:$0xff] }
 0x37e   : > { %v5499_v37 = vmax.f32 %v1663_v57, 0.0  ;;  %v6170_v57 = vld [vmem:[#allocation36_spill] sm:$0xff] }
 0x37f   : > { %v5497_v29 = vmax.f32 %v1664_v50, 0.0  ;;  %v6172_v50 = vld [vmem:[#allocation38_spill] sm:$0xff] }
 0x381   : > { %1731 = vmatprep.mubr.f32.mxu0 %v5497_v29  ;;  %1815 = vmatprep.subr.mxu1 %v5497_v29 }
 0x382   : > { %1732 = vmatmul.mubr.f32.vlgmr.msra.gmra.mrb[8].mxu0 %v5499_v37  ;;  %1816 = vmatpush1.msra.mxu1 %v5499_v37 }
 0x383   : > { %4205 = vmatpush1.bf16.msra.mxu0 %v5122_v4  ;;  %1802 = vmatprep.mubr.f32.mxu0 %v5497_v29 }
 0x384   : > { %4207 = vmatprep.subr.bf16.mxu0 %v5125_v5 }
 0x387   : > { %4209 = vmatpush1.bf16.msra.mxu0 %v5129_v17 }
 0x388   : > { %4211 = vmatprep.subr.bf16.mxu0 %v5133_v18 }
 0x38b   : > { %4213 = vmatpush1.bf16.msra.mxu0 %v5136_v31 }
 0x38c   : > { %4215 = vmatprep.subr.bf16.mxu0 %v5139_v34 }
 0x38f   : > { %4217 = vmatpush1.bf16.msra.mxu0 %v5142_v44 }
 0x390   : > { %4219 = vmatprep.subr.bf16.mxu0 %v5145_v48 }
 0x393   : > { %4221 = vmatpush1.bf16.msra.mxu0 %v5148_v61 }
 0x394   : > { %4223 = vmatprep.subr.bf16.mxu0 %v5151_v62  ;;  %v6173_v62 = vld [vmem:[#allocation39_spill] sm:$0xff] }
 0x397   : > { %4225 = vmatpush1.bf16.msra.mxu0 %v5154_v12  ;;  %v6174_v12 = vld [vmem:[#allocation40_spill] sm:$0xff] }
 0x398   : > { %4227 = vmatprep.subr.bf16.mxu0 %v5157_v16  ;;  %v6175_v16 = vld [vmem:[#allocation41_spill] sm:$0xff] }
 0x39b   : > { %4229 = vmatpush1.bf16.msra.mxu0 %v6165_v35  ;;  %v6176_v35 = vld [vmem:[#allocation42_spill] sm:$0xff] }
 0x39c   : > { %4231 = vmatprep.subr.bf16.mxu0 %v6166_v9  ;;  %v6177_v9 = vld [vmem:[#allocation43_spill] sm:$0xff] }
 0x39f   : > { %4233 = vmatpush1.bf16.msra.mxu0 %v6167_v24  ;;  %v6178_v24 = vld [vmem:[#allocation44_spill] sm:$0xff] }
 0x3a0   : > { %4235 = vmatprep.subr.bf16.mxu0 %v6168_v43  ;;  %v6179_v43 = vld [vmem:[#allocation45_spill] sm:$0xff] }
 0x3a3   : > { %4237 = vmatpush1.bf16.msra.mxu0 %v6169_v51  ;;  %v6180_v51 = vld [vmem:[#allocation46_spill] sm:$0xff] }
 0x3a4   : > { %4239 = vmatprep.subr.bf16.mxu0 %v6170_v57  ;;  %v6181_v57 = vld [vmem:[#allocation47_spill] sm:$0xff] }
 0x3a7   : > { %4241 = vmatpush1.bf16.msra.mxu0 %v6171_v60  ;;  %v6182_v60 = vld [vmem:[#allocation48_spill] sm:$0xff] }
 0x3a8   : > { %4243 = vmatprep.subr.bf16.mxu0 %v6172_v50  ;;  %v6183_v50 = vld [vmem:[#allocation49_spill] sm:$0xff] }
 0x3ab   : > { %4245 = vmatpush1.bf16.msra.mxu0 %v6173_v62 }
 0x3ac   : > { %4247 = vmatprep.subr.bf16.mxu0 %v6174_v12 }
 0x3af   : > { %4249 = vmatpush1.bf16.msra.mxu0 %v6175_v16 }
 0x3b0   : > { %4251 = vmatprep.subr.bf16.mxu0 %v6176_v35 }
 0x3b3   : > { %4253 = vmatpush1.bf16.msra.mxu0 %v6177_v9  ;;  %v3827_v9 = vld [vmem:[%s5920_s4 + $0x8] sm:$0xf] }
 0x3b4   : > { %4255 = vmatprep.subr.bf16.mxu0 %v6178_v24 }
 0x3b7   : > { %4257 = vmatpush1.bf16.msra.mxu0 %v6179_v43  ;;  %v3824_v43 = vld [vmem:[%s5920_s4 + $0x4] sm:$0xf] }
 0x3b8   : > { %4259 = vmatprep.subr.bf16.mxu0 %v6180_v51  ;;  %3825 = vmatmul.mubr.msk.f32.vlgmr.msra.gmra.mrb[4].mxu1 %vm696_vm0, %v3824_v43  ;;  %v1809_v51 = vld [vmem:[%s5920_s4] sm:$0xf]  ;;  %v3829_v43 = vld [vmem:[%s5920_s4 + $0xc] sm:$0xf] }
 0x3b9   : > { %1953 = vmatprep.mubr.f32.mxu1 %v6121_v6 }
 0x3bb   : > { %4261 = vmatpush1.bf16.msra.mxu0 %v6181_v57 }
 0x3bc   : > { %4263 = vmatprep.subr.bf16.mxu0 %v6182_v60  ;;  %v3830_v60 = vld [vmem:[%s5920_s4 + $0x10] sm:$0xf] }
 0x3bf   : > { %4265 = vmatpush1.bf16.msra.mxu0 %v6183_v50 }
 0x3c0   : > { %2045 = vmatprep.subr.mxu0 %v5497_v29 }
 0x3c2   : > { %1803 = vmatmul.mubr.f32.vlgmr.msra.gmra.mrb[10].mxu0 %v5499_v37 }
 0x3c3   : > { %2046 = vmatpush1.msra.mxu0 %v5499_v37  ;;  %2109 = vmatprep.mubr.f32.mxu0 %v6121_v6 }
 0x3c6   : > { %3831 = vmatmul.mubr.msk.f32.vlgmr.msra.gmra.mrb[12].mxu0 %vm696_vm0, %v3830_v60 }
 0x3c7   : > { %2183 = vmatprep.mubr.f32.mxu0 %v6121_v6 }
 0x455   : > { %v1733_v50 = vpop.f32.mrb[8].mxu0 }
 0x456   : > { %v1735_v57 = vpop.f32.mrb[9].mxu0 }
 0x457   : > { %1889 = vmatprep.subr.mxu1 %v1735_v57  ;;  %2119 = vmatprep.subr.mxu0 %v1735_v57 }
 0x458   : > { %1890 = vmatpush1.msra.mxu1 %v1733_v50  ;;  %2120 = vmatpush1.msra.mxu0 %v1733_v50 }
 0x459   : > { %3826 = vmatmul.mubr.msk.f32.vlgmr.msra.gmra.mrb[4].mxu1 %vm696_vm0, %v1809_v51  ;;  %3832 = vmatmul.mubr.msk.f32.vlgmr.msra.gmra.mrb[12].mxu0 %vm696_vm0, %v3829_v43  ;;  %v3833_v51 = vld [vmem:[%s5920_s4 + $0x14] sm:$0xf]  ;;  %v3836_v43 = vld [vmem:[%s5920_s4 + $0x1c] sm:$0xf] }
 0x45a   : > { %2029 = vmatprep.mubr.f32.mxu1 %v6121_v6  ;;  %2259 = vmatprep.mubr.f32.mxu0 %v6121_v6 }
 0x495   : > { %v1804_v60 = vpop.f32.mrb[10].mxu0 }
 0x496   : > { %v1806_v24 = vpop.f32.mrb[11].mxu0 }
 0x497   : > { %1965 = vmatprep.subr.mxu1 %v1806_v24  ;;  %2195 = vmatprep.subr.mxu0 %v1806_v24 }
 0x498   : > { %1966 = vmatpush1.msra.mxu1 %v1804_v60  ;;  %2196 = vmatpush1.msra.mxu0 %v1804_v60 }
 0x499   : > { %3828 = vmatmul.mubr.msk.f32.vlgmr.msra.gmra.mrb[4].mxu1 %vm696_vm0, %v3827_v9  ;;  %2346 = vmatprep.subr.mxu1 %v5497_v29  ;;  %v6184_v29 = vld [vmem:[#allocation50_spill] sm:$0xff]  ;;  %v6185_v9 = vld [vmem:[#allocation51_spill] sm:$0xff] }
 0x49a   : > { %2347 = vmatpush1.msra.mxu1 %v5499_v37  ;;  %2410 = vmatprep.mubr.f32.mxu1 %v6121_v6  ;;  %v3835_v37 = vld [vmem:[%s5920_s4 + $0x18] sm:$0xf] }
 0x49b   : > { %2420 = vmatprep.subr.mxu1 %v1735_v57  ;;  %4267 = vmatprep.subr.bf16.mxu0 %v5240_v14  ;;  %v6187_v57 = vld [vmem:[#allocation52_spill] sm:$0xff] }
 0x49c   : > { %3834 = vmatmul.mubr.msk.f32.vlgmr.msra.gmra.mrb[12].mxu0 %vm696_vm0, %v3833_v51  ;;  %v6188_v51 = vld [vmem:[#allocation53_spill] sm:$0xff] }
 0x49d   : > { %3837 = vmatmul.mubr.msk.f32.vlgmr.msra.gmra.mrb[6].mxu1 %vm696_vm0, %v3836_v43  ;;  %4269 = vmatpush1.bf16.msra.mxu0 %v5247_v2  ;;  %v6190_v43 = vld [vmem:[#allocation54_spill] sm:$0xff] }
 0x49e   : > { %2421 = vmatpush1.msra.mxu1 %v1733_v50  ;;  %2484 = vmatprep.mubr.f32.mxu1 %v6121_v6  ;;  %v3839_v50 = vld [vmem:[%s5920_s4 + $0x20] sm:$0xf] }
 0x49f   : > { %2496 = vmatprep.subr.mxu1 %v1806_v24  ;;  %4271 = vmatprep.subr.bf16.mxu0 %v5255_v42  ;;  %v6186_v24 = vld [vmem:[#allocation8_spill] sm:$0xff] }
 0x4a1   : > { %4273 = vmatpush1.bf16.msra.mxu0 %v6184_v29 }
 0x4a2   : > { %4275 = vmatprep.subr.bf16.mxu0 %v6185_v9 }
 0x4a5   : > { %3838 = vmatmul.mubr.msk.f32.vlgmr.msra.gmra.mrb[6].mxu1 %vm696_vm0, %v3835_v37  ;;  %4277 = vmatpush1.bf16.msra.mxu0 %v5267_v25  ;;  %v6191_v37 = vld [vmem:[#allocation10_spill] sm:$0xff] }
 0x4a6   : > { %2497 = vmatpush1.msra.mxu1 %v1804_v60  ;;  %2560 = vmatprep.mubr.f32.mxu1 %v6121_v6  ;;  %v6189_v60 = vld [vmem:[#allocation9_spill] sm:$0xff] }
 0x4a7   : > { %4279 = vmatprep.subr.bf16.mxu0 %v5273_v23  ;;  %4395 = vmatprep.subr.bf16.mxu1 %v6186_v24  ;;  %v6192_v24 = vld [vmem:[#allocation55_spill] sm:$0xff] }
 0x4a9   : > { %4281 = vmatpush1.bf16.msra.mxu0 %v6187_v57 }
 0x4aa   : > { %4283 = vmatprep.subr.bf16.mxu0 %v6188_v51 }
 0x4ad   : > { %3840 = vmatmul.mubr.msk.f32.vlgmr.msra.gmra.mrb[6].mxu1 %vm696_vm0, %v3839_v50  ;;  %4285 = vmatpush1.bf16.msra.mxu0 %v5285_v63  ;;  %v6193_v50 = vld [vmem:[#allocation11_spill] sm:$0xff] }
 0x4ae   : > { %4287 = vmatprep.subr.bf16.mxu0 %v5291_v36  ;;  %4397 = vmatpush1.bf16.msra.mxu1 %v6189_v60  ;;  %v6194_v60 = vld [vmem:[#allocation56_spill] sm:$0xff] }
 0x4af   : > { %4399 = vmatprep.subr.bf16.mxu1 %v5008_v8  ;;  %v6195_v8 = vld [vmem:[#allocation12_spill] sm:$0xff] }
 0x4b1   : > { %4289 = vmatpush1.bf16.msra.mxu0 %v5295_v3 }
 0x4b2   : > { %4291 = vmatprep.subr.bf16.mxu0 %v6190_v43  ;;  %4401 = vmatpush1.bf16.msra.mxu1 %v6191_v37  ;;  %v6196_v37 = vld [vmem:[#allocation57_spill] sm:$0xff] }
 0x4b3   : > { %4403 = vmatprep.subr.bf16.mxu1 %v5017_v15  ;;  %v6197_v15 = vld [vmem:[#allocation13_spill] sm:$0xff] }
 0x4b5   : > { %4293 = vmatpush1.bf16.msra.mxu0 %v5303_v41 }
 0x4b6   : > { %4295 = vmatprep.subr.bf16.mxu0 %v6192_v24  ;;  %4405 = vmatpush1.bf16.msra.mxu1 %v6193_v50  ;;  %v6198_v50 = vld [vmem:[#allocation58_spill] sm:$0xff] }
 0x4b7   : > { %4407 = vmatprep.subr.bf16.mxu1 %v5023_v21  ;;  %v6199_v21 = vld [vmem:[#allocation14_spill] sm:$0xff] }
 0x4b9   : > { %4297 = vmatpush1.bf16.msra.mxu0 %v5311_v7 }
 0x4ba   : > { %4299 = vmatprep.subr.bf16.mxu0 %v6194_v60  ;;  %4409 = vmatpush1.bf16.msra.mxu1 %v6195_v8  ;;  %v6200_v8 = vld [vmem:[#allocation59_spill] sm:$0xff] }
 0x4bb   : > { %4411 = vmatprep.subr.bf16.mxu1 %v5031_v27  ;;  %v6201_v27 = vld [vmem:[#allocation15_spill] sm:$0xff] }
 0x4bd   : > { %4301 = vmatpush1.bf16.msra.mxu0 %v5319_v13 }
 0x4be   : > { %4303 = vmatprep.subr.bf16.mxu0 %v6196_v37  ;;  %4413 = vmatpush1.bf16.msra.mxu1 %v6197_v15  ;;  %v6202_v15 = vld [vmem:[#allocation60_spill] sm:$0xff] }
 0x4bf   : > { %4415 = vmatprep.subr.bf16.mxu1 %v5038_v33  ;;  %v6203_v33 = vld [vmem:[#allocation16_spill] sm:$0xff] }
 0x4c1   : > { %4305 = vmatpush1.bf16.msra.mxu0 %v5327_v20 }
 0x4c2   : > { %4307 = vmatprep.subr.bf16.mxu0 %v6198_v50  ;;  %4417 = vmatpush1.bf16.msra.mxu1 %v6199_v21  ;;  %v6212_v21 = vld [vmem:[#allocation23_spill] sm:$0xff] }
 0x4c3   : > { %4419 = vmatprep.subr.bf16.mxu1 %v5047_v39  ;;  %v6204_v39 = vld [vmem:[#allocation17_spill] sm:$0xff] }
 0x4c5   : > { %4309 = vmatpush1.bf16.msra.mxu0 %v5335_v26 }
 0x4c6   : > { %4311 = vmatprep.subr.bf16.mxu0 %v6200_v8  ;;  %4421 = vmatpush1.bf16.msra.mxu1 %v6201_v27  ;;  %v6213_v27 = vld [vmem:[#allocation24_spill] sm:$0xff] }
 0x4c7   : > { %4423 = vmatprep.subr.bf16.mxu1 %v5060_v47  ;;  %v6205_v47 = vld [vmem:[#allocation61_spill] sm:$0xff] }
 0x4c9   : > { %4313 = vmatpush1.bf16.msra.mxu0 %v5343_v32 }
 0x4ca   : > { %4315 = vmatprep.subr.bf16.mxu0 %v6202_v15  ;;  %4425 = vmatpush1.bf16.msra.mxu1 %v5063_v52  ;;  %v6206_v52 = vld [vmem:[#allocation62_spill] sm:$0xff] }
 0x4cb   : > { %4427 = vmatprep.subr.bf16.mxu1 %v5066_v53  ;;  %v6207_v53 = vld [vmem:[#allocation18_spill] sm:$0xff] }
 0x4cd   : > { %4317 = vmatpush1.bf16.msra.mxu0 %v5351_v38 }
 0x4ce   : > { %4319 = vmatprep.subr.bf16.mxu0 %v5354_v11  ;;  %4429 = vmatpush1.bf16.msra.mxu1 %v5069_v58  ;;  %v6208_v58 = vld [vmem:[#allocation19_spill] sm:$0xff] }
 0x4cf   : > { %4431 = vmatprep.subr.bf16.mxu1 %v5072_v59  ;;  %v6209_v59 = vld [vmem:[#allocation20_spill] sm:$0xff] }
 0x4d1   : > { %4321 = vmatpush1.bf16.msra.mxu0 %v5359_v46 }
 0x4d2   : > { %4323 = vmatprep.subr.bf16.mxu0 %v5362_v45  ;;  %4433 = vmatpush1.bf16.msra.mxu1 %v5075_v0  ;;  %v6210_v0 = vld [vmem:[#allocation21_spill] sm:$0xff] }
 0x4d3   : > { %4435 = vmatprep.subr.bf16.mxu1 %v5078_v1  ;;  %v6211_v1 = vld [vmem:[#allocation22_spill] sm:$0xff] }
 0x4d5   : > { %4325 = vmatpush1.bf16.msra.mxu0 %v5367_v55 }
 0x4d6   : > { %4327 = vmatprep.subr.bf16.mxu0 %v5384_v28  ;;  %4437 = vmatpush1.bf16.msra.mxu1 %v6203_v33  ;;  %v6214_v33 = vld [vmem:[#allocation25_spill] sm:$0xff] }
 0x4d7   : > { %4439 = vmatprep.subr.bf16.mxu1 %v6204_v39  ;;  %v6215_v39 = vld [vmem:[#allocation26_spill] sm:$0xff] }
 0x4d9   : > { %4329 = vmatpush1.bf16.msra.mxu0 %v6205_v47  ;;  %v6216_v47 = vld [vmem:[#allocation27_spill] sm:$0xff] }
 0x4da   : > { %4331 = vmatprep.subr.bf16.mxu0 %v6206_v52  ;;  %4441 = vmatpush1.bf16.msra.mxu1 %v6207_v53 }
 0x4db   : > { %4443 = vmatprep.subr.bf16.mxu1 %v6208_v58  ;;  %v6217_v58 = vld [vmem:[#allocation64_spill] sm:$0xff] }
 0x4de   : > { %4445 = vmatpush1.bf16.msra.mxu1 %v6209_v59  ;;  %v6218_v59 = vld [vmem:[#allocation65_spill] sm:$0xff] }
 0x4df   : > { %4447 = vmatprep.subr.bf16.mxu1 %v6210_v0  ;;  %v6219_v0 = vld [vmem:[#allocation66_spill] sm:$0xff] }
 0x4e2   : > { %4449 = vmatpush1.bf16.msra.mxu1 %v6211_v1  ;;  %v6220_v1 = vld [vmem:[#allocation67_spill] sm:$0xff] }
 0x4e3   : > { %4451 = vmatprep.subr.bf16.mxu1 %v6212_v21  ;;  %v6221_v21 = vld [vmem:[#allocation68_spill] sm:$0xff] }
 0x4e6   : > { %4453 = vmatpush1.bf16.msra.mxu1 %v6213_v27  ;;  %v6222_v27 = vld [vmem:[#allocation69_spill] sm:$0xff] }
 0x4e7   : > { %4455 = vmatprep.subr.bf16.mxu1 %v6214_v33 }
 0x4ea   : > { %4457 = vmatpush1.bf16.msra.mxu1 %v6215_v39 }
 0x4eb   : > { %4459 = vmatprep.subr.bf16.mxu1 %v6216_v47  ;;  %v6223_v47 = vld [vmem:[#allocation70_spill] sm:$0xff] }
 0x56c   : > { %v2031_v52 = vpop.f32.mrb[4].mxu1 }
 0x56d   : > { %v2033_v53 = vpop.f32.mrb[5].mxu1 }
 0x56e   : > { %2332 = vmatprep.mubr.f32.mxu0 %v2033_v53  ;;  %v6225_v53 = vld [vmem:[#allocation72_spill] sm:$0xff] }
 0x56f   : > { %2333 = vmatmul.mubr.f32.vlgmr.msra.gmra.mrb[12].mxu0 %v2031_v52  ;;  %v6224_v52 = vld [vmem:[#allocation71_spill] sm:$0xff] }
 0x570   : > { %4333 = vmatpush1.bf16.msra.mxu0 %v5400_v19 }
 0x571   : > { %4335 = vmatprep.subr.bf16.mxu0 %v5402_v40  ;;  %v6233_v40 = vld [vmem:[#allocation80_spill] sm:$0xff] }
 0x574   : > { %4337 = vmatpush1.bf16.msra.mxu0 %v6217_v58  ;;  %v6226_v58 = vld [vmem:[#allocation73_spill] sm:$0xff] }
 0x575   : > { %4339 = vmatprep.subr.bf16.mxu0 %v6218_v59  ;;  %v6227_v59 = vld [vmem:[#allocation74_spill] sm:$0xff] }
 0x578   : > { %4341 = vmatpush1.bf16.msra.mxu0 %v6219_v0  ;;  %v6228_v0 = vld [vmem:[#allocation75_spill] sm:$0xff] }
 0x579   : > { %4343 = vmatprep.subr.bf16.mxu0 %v6220_v1  ;;  %v6229_v1 = vld [vmem:[#allocation76_spill] sm:$0xff] }
 0x57c   : > { %4345 = vmatpush1.bf16.msra.mxu0 %v6221_v21  ;;  %v6230_v21 = vld [vmem:[#allocation77_spill] sm:$0xff] }
 0x57d   : > { %4347 = vmatprep.subr.bf16.mxu0 %v6222_v27  ;;  %v6231_v27 = vld [vmem:[#allocation78_spill] sm:$0xff] }
 0x580   : > { %4349 = vmatpush1.bf16.msra.mxu0 %v6223_v47  ;;  %v2562_v33 = vpop.f32.mrb[6].mxu1  ;;  %v6232_v47 = vld [vmem:[#allocation79_spill] sm:$0xff] }
 0x581   : > { %4351 = vmatprep.subr.bf16.mxu0 %v6224_v52  ;;  %v2564_v39 = vpop.f32.mrb[7].mxu1 }
 0x582   : > { %2633 = vmatprep.mubr.f32.mxu0 %v2564_v39  ;;  %v6234_v39 = vld [vmem:[#allocation81_spill] sm:$0xff] }
 0x584   : > { %4353 = vmatpush1.bf16.msra.mxu0 %v6225_v53  ;;  %v6235_v53 = vld [vmem:[#allocation82_spill] sm:$0xff] }
 0x585   : > { %4355 = vmatprep.subr.bf16.mxu0 %v6226_v58  ;;  %v6236_v58 = vld [vmem:[#allocation83_spill] sm:$0xff] }
 0x588   : > { %4357 = vmatpush1.bf16.msra.mxu0 %v6227_v59  ;;  %v6237_v59 = vld [vmem:[#allocation84_spill] sm:$0xff] }
 0x589   : > { %4359 = vmatprep.subr.bf16.mxu0 %v6228_v0  ;;  %v6238_v0 = vld [vmem:[#allocation85_spill] sm:$0xff] }
 0x58c   : > { %4361 = vmatpush1.bf16.msra.mxu0 %v6229_v1  ;;  %v6239_v1 = vld [vmem:[#allocation86_spill] sm:$0xff] }
 0x58d   : > { %4363 = vmatprep.subr.bf16.mxu0 %v6230_v21 }
 0x590   : > { %4365 = vmatpush1.bf16.msra.mxu0 %v6231_v27 }
 0x591   : > { %4367 = vmatprep.subr.bf16.mxu0 %v6232_v47 }
 0x594   : > { %4369 = vmatpush1.bf16.msra.mxu0 %v6233_v40 }
 0x595   : > { %4371 = vmatprep.subr.bf16.mxu0 %v6234_v39 }
 0x598   : > { %4373 = vmatpush1.bf16.msra.mxu0 %v6235_v53 }
 0x599   : > { %4375 = vmatprep.subr.bf16.mxu0 %v6236_v58 }
 0x59c   : > { %4377 = vmatpush1.bf16.msra.mxu0 %v6237_v59 }
 0x59d   : > { %4379 = vmatprep.subr.bf16.mxu0 %v6238_v0 }
 0x5a0   : > { %4381 = vmatpush1.bf16.msra.mxu0 %v6239_v1  ;;  %v2646_v1 = vpop.permute.xlu0 %2645 }
 0x5a1   : > { %4383 = vmatprep.subr.bf16.mxu0 %v5476_v49  ;;  %v2650_v49 = vld [vmem:[%s411_s30] sm:$0xff] }
 0x5a2   : > { %v2652_v0 = vcombine.high %v2650_v49, %v2650_v49 }
 0x5a4   : > { %4385 = vmatpush1.bf16.msra.mxu0 %v5479_v10 }
 0x5a5   : > { %4387 = vmatprep.subr.bf16.mxu0 %v5482_v54 }
 0x5a8   : > { %4389 = vmatpush1.bf16.msra.mxu0 %v5485_v22 }
 0x5a9   : > { %4391 = vmatprep.subr.bf16.mxu0 %v5488_v30 }
 0x5ac   : > { %4393 = vmatpush1.bf16.msra.mxu0 %v5491_v56 }
 0x5af   : > { %2634 = vmatmul.mubr.f32.vlgmr.msra.gmra.mrb[12].mxu0 %v2562_v33 }
 0x5b0   : > { %2878 = vmatprep.mubr.f32.mxu0 %v6121_v6 }
 0x682   : > { %v2635_v10 = vpop.f32.mrb[12].mxu0 }
 0x683   : > { %v2648_v54 = vadd.f32 %v2646_v1, %v2635_v10  ;;  %v2637_v59 = vpop.f32.mrb[13].mxu0  ;;  %v6242_v10 = vld [vmem:[#allocation30_spill] sm:$0xff] }
 0x684   : > { %v2649_v22 = vadd.f32 %v2646_v1, %v2637_v59  ;;  %v6255_v59 = vld [vmem:[#allocation47_spill] sm:$0xff]  ;;  %v6257_v1 = vld [vmem:[#allocation49_spill] sm:$0xff] }
 0x685   : > { %v2654_v58 = vadd.f32 %v2650_v49, %v2648_v54  ;;  %v6240_v49 = vld [vmem:[#allocation28_spill] sm:$0xff]  ;;  %v6251_v54 = vld [vmem:[#allocation43_spill] sm:$0xff] }
 0x686   : > { %v2655_v30 = vadd.f32 %v2652_v0, %v2649_v22  ;;  %v6252_v22 = vld [vmem:[#allocation44_spill] sm:$0xff] }
 0x687   : > { %v5692_v33 = vmax.f32 %v2654_v58, 0.0  ;;  %v6254_v58 = vld [vmem:[#allocation46_spill] sm:$0xff]  ;;  %v6256_v0 = vld [vmem:[#allocation48_spill] sm:$0xff] }
 0x688   : > { %v5690_v56 = vmax.f32 %v2655_v30, 0.0  ;;  %v6253_v30 = vld [vmem:[#allocation45_spill] sm:$0xff] }
 0x68a   : > { %2722 = vmatprep.mubr.f32.mxu1 %v5690_v56  ;;  %3842 = vmatprep.subr.msk.mxu0 %vm2807_vm1, %v5690_v56 }
 0x68b   : > { %2723 = vmatmul.mubr.f32.vlgmr.msra.gmra.mrb[8].mxu1 %v5692_v33  ;;  %3843 = vmatpush1.msk.msra.mxu0 %vm2807_vm1, %v5692_v33 }
 0x68c   : > { %4461 = vmatpush1.bf16.msra.mxu1 %v5122_v4  ;;  %2793 = vmatprep.mubr.f32.mxu1 %v5690_v56  ;;  %v6241_v4 = vld [vmem:[#allocation29_spill] sm:$0xff] }
 0x68d   : > { %4463 = vmatprep.subr.bf16.mxu1 %v5125_v5  ;;  %v6243_v5 = vld [vmem:[#allocation31_spill] sm:$0xff] }
 0x690   : > { %4465 = vmatpush1.bf16.msra.mxu1 %v5129_v17  ;;  %v6244_v17 = vld [vmem:[#allocation32_spill] sm:$0xff] }
 0x691   : > { %4467 = vmatprep.subr.bf16.mxu1 %v5133_v18  ;;  %v6245_v18 = vld [vmem:[#allocation33_spill] sm:$0xff] }
 0x694   : > { %4469 = vmatpush1.bf16.msra.mxu1 %v5136_v31  ;;  %v6246_v31 = vld [vmem:[#allocation34_spill] sm:$0xff] }
 0x695   : > { %4471 = vmatprep.subr.bf16.mxu1 %v5139_v34  ;;  %v6247_v34 = vld [vmem:[#allocation35_spill] sm:$0xff] }
 0x698   : > { %4473 = vmatpush1.bf16.msra.mxu1 %v5142_v44  ;;  %v6248_v44 = vld [vmem:[#allocation36_spill] sm:$0xff] }
 0x699   : > { %4475 = vmatprep.subr.bf16.mxu1 %v5145_v48  ;;  %v6249_v48 = vld [vmem:[#allocation37_spill] sm:$0xff] }
 0x69c   : > { %4477 = vmatpush1.bf16.msra.mxu1 %v5148_v61  ;;  %v6250_v61 = vld [vmem:[#allocation38_spill] sm:$0xff] }
 0x69d   : > { %4479 = vmatprep.subr.bf16.mxu1 %v6240_v49  ;;  %v2800_v49 = vld [vmem:[%s5923_s7] sm:$0xf] }
 0x6a0   : > { %4481 = vmatpush1.bf16.msra.mxu1 %v6241_v4  ;;  %v3852_v4 = vld [vmem:[%s5923_s7 + $0xc] sm:$0xf] }
 0x6a1   : > { %4483 = vmatprep.subr.bf16.mxu1 %v6242_v10 }
 0x6a4   : > { %4485 = vmatpush1.bf16.msra.mxu1 %v6243_v5 }
 0x6a5   : > { %4487 = vmatprep.subr.bf16.mxu1 %v6244_v17  ;;  %v3848_v17 = vld [vmem:[%s5923_s7 + $0x8] sm:$0xf] }
 0x6a8   : > { %4489 = vmatpush1.bf16.msra.mxu1 %v6245_v18  ;;  %v3860_v18 = vld [vmem:[%s5923_s7 + $0x14] sm:$0xf] }
 0x6a9   : > { %4491 = vmatprep.subr.bf16.mxu1 %v6246_v31  ;;  %v3865_v31 = vld [vmem:[%s5923_s7 + $0x1c] sm:$0xf] }
 0x6ac   : > { %4493 = vmatpush1.bf16.msra.mxu1 %v6247_v34 }
 0x6ad   : > { %4495 = vmatprep.subr.bf16.mxu1 %v6248_v44 }
 0x6b0   : > { %4497 = vmatpush1.bf16.msra.mxu1 %v6249_v48 }
 0x6b1   : > { %4499 = vmatprep.subr.bf16.mxu1 %v6250_v61 }
 0x6b4   : > { %4501 = vmatpush1.bf16.msra.mxu1 %v6173_v62  ;;  %v3841_v62 = vld [vmem:[%s5923_s7 + $0x4] sm:$0xf] }
 0x6b5   : > { %4503 = vmatprep.subr.bf16.mxu1 %v6174_v12  ;;  %3844 = vmatmul.mubr.msk.f32.vlgmr.msra.gmra.mrb[14].mxu0 %vm2803_vm2, %v3841_v62  ;;  %v3853_v12 = vld [vmem:[%s5923_s7 + $0x10] sm:$0xf] }
 0x6b6   : > { %2958 = vmatprep.mubr.f32.mxu0 %v6121_v6 }
 0x6b8   : > { %4505 = vmatpush1.bf16.msra.mxu1 %v6175_v16 }
 0x6b9   : > { %4507 = vmatprep.subr.bf16.mxu1 %v6176_v35 }
 0x6bc   : > { %4509 = vmatpush1.bf16.msra.mxu1 %v6251_v54 }
 0x6bd   : > { %4511 = vmatprep.subr.bf16.mxu1 %v6252_v22 }
 0x6c0   : > { %4513 = vmatpush1.bf16.msra.mxu1 %v6253_v30 }
 0x6c1   : > { %4515 = vmatprep.subr.bf16.mxu1 %v6254_v58 }
 0x6c4   : > { %4517 = vmatpush1.bf16.msra.mxu1 %v6255_v59 }
 0x6c5   : > { %4519 = vmatprep.subr.bf16.mxu1 %v6256_v0 }
 0x6c8   : > { %4521 = vmatpush1.bf16.msra.mxu1 %v6257_v1 }
 0x6c9   : > { %3854 = vmatprep.subr.msk.mxu1 %vm2807_vm1, %v5690_v56 }
 0x6cb   : > { %2794 = vmatmul.mubr.f32.vlgmr.msra.gmra.mrb[10].mxu1 %v5692_v33 }
 0x6cc   : > { %3855 = vmatpush1.msk.msra.mxu1 %vm2807_vm1, %v5692_v33  ;;  %3120 = vmatprep.mubr.f32.mxu1 %v6121_v6 }
 0x6cf   : > { %3856 = vmatmul.mubr.msk.f32.vlgmr.msra.gmra.mrb[12].mxu1 %vm2803_vm2, %v3853_v12 }
 0x6d0   : > { %3194 = vmatprep.mubr.f32.mxu1 %v6121_v6 }
 0x75e   : > { %v2724_v16 = vpop.f32.mrb[8].mxu1 }
 0x75f   : > { %v2726_v35 = vpop.f32.mrb[9].mxu1 }
 0x760   : > { %3845 = vmatprep.subr.msk.mxu0 %vm2807_vm1, %v2726_v35  ;;  %3857 = vmatprep.subr.msk.mxu1 %vm2807_vm1, %v2726_v35 }
 0x761   : > { %3846 = vmatpush1.msk.msra.mxu0 %vm2807_vm1, %v2724_v16  ;;  %3858 = vmatpush1.msk.msra.mxu1 %vm2807_vm1, %v2724_v16 }
 0x762   : > { %3847 = vmatmul.mubr.msk.f32.vlgmr.msra.gmra.mrb[14].mxu0 %vm2803_vm2, %v2800_v49  ;;  %3859 = vmatmul.mubr.msk.f32.vlgmr.msra.gmra.mrb[12].mxu1 %vm2803_vm2, %v3852_v4 }
 0x763   : > { %3040 = vmatprep.mubr.f32.mxu0 %v6121_v6  ;;  %3270 = vmatprep.mubr.f32.mxu1 %v6121_v6 }
 0x79e   : > { %v2795_v10 = vpop.f32.mrb[10].mxu1 }
 0x79f   : > { %v2797_v5 = vpop.f32.mrb[11].mxu1 }
 0x7a0   : > { %3849 = vmatprep.subr.msk.mxu0 %vm2807_vm1, %v2797_v5  ;;  %3861 = vmatprep.subr.msk.mxu1 %vm2807_vm1, %v2797_v5 }
 0x7a1   : > { %3850 = vmatpush1.msk.msra.mxu0 %vm2807_vm1, %v2795_v10  ;;  %3862 = vmatpush1.msk.msra.mxu1 %vm2807_vm1, %v2795_v10 }
 0x7a2   : > { %3851 = vmatmul.mubr.msk.f32.vlgmr.msra.gmra.mrb[14].mxu0 %vm2803_vm2, %v3848_v17  ;;  %3866 = vmatprep.subr.msk.mxu0 %vm2807_vm1, %v5690_v56  ;;  %v6273_v56 = vld [vmem:[#allocation83_spill] sm:$0xff] }
 0x7a3   : > { %3867 = vmatpush1.msk.msra.mxu0 %vm2807_vm1, %v5692_v33  ;;  %3421 = vmatprep.mubr.f32.mxu0 %v6121_v6 }
 0x7a4   : > { %3869 = vmatprep.subr.msk.mxu0 %vm2807_vm1, %v2726_v35  ;;  %4523 = vmatprep.subr.bf16.mxu1 %v5240_v14  ;;  %v3864_v14 = vld [vmem:[%s5923_s7 + $0x18] sm:$0xf] }
 0x7a5   : > { %3863 = vmatmul.mubr.msk.f32.vlgmr.msra.gmra.mrb[12].mxu1 %vm2803_vm2, %v3860_v18 }
 0x7a6   : > { %3868 = vmatmul.mubr.msk.f32.vlgmr.msra.gmra.mrb[16].mxu0 %vm2803_vm2, %v3865_v31  ;;  %4525 = vmatpush1.bf16.msra.mxu1 %v5247_v2  ;;  %v3872_v2 = vld [vmem:[%s5923_s7 + $0x20] sm:$0xf] }
 0x7a7   : > { %3870 = vmatpush1.msk.msra.mxu0 %vm2807_vm1, %v2724_v16  ;;  %3495 = vmatprep.mubr.f32.mxu0 %v6121_v6 }
 0x7a8   : > { %3873 = vmatprep.subr.msk.mxu0 %vm2807_vm1, %v2797_v5  ;;  %4527 = vmatprep.subr.bf16.mxu1 %v5255_v42  ;;  %v6264_v42 = vld [vmem:[#allocation67_spill] sm:$0xff] }
 0x7aa   : > { %4529 = vmatpush1.bf16.msra.mxu1 %v6184_v29  ;;  %v6274_v29 = vld [vmem:[#allocation84_spill] sm:$0xff] }
 0x7ab   : > { %4531 = vmatprep.subr.bf16.mxu1 %v6185_v9  ;;  %v6275_v9 = vld [vmem:[#allocation85_spill] sm:$0xff] }
 0x7ae   : > { %3871 = vmatmul.mubr.msk.f32.vlgmr.msra.gmra.mrb[16].mxu0 %vm2803_vm2, %v3864_v14  ;;  %4533 = vmatpush1.bf16.msra.mxu1 %v5267_v25  ;;  %v6265_v25 = vld [vmem:[#allocation68_spill] sm:$0xff] }
 0x7af   : > { %3874 = vmatpush1.msk.msra.mxu0 %vm2807_vm1, %v2795_v10  ;;  %3571 = vmatprep.mubr.f32.mxu0 %v6121_v6  ;;  %v6263_v6 = vld [vmem:[#allocation66_spill] sm:$0xff] }
 0x7b0   : > { %4535 = vmatprep.subr.bf16.mxu1 %v5273_v23  ;;  %v6266_v23 = vld [vmem:[#allocation69_spill] sm:$0xff] }
 0x7b2   : > { %4537 = vmatpush1.bf16.msra.mxu1 %v6187_v57  ;;  %v6276_v57 = vld [vmem:[#allocation86_spill] sm:$0xff] }
 0x7b3   : > { %4539 = vmatprep.subr.bf16.mxu1 %v6188_v51  ;;  %v6277_v51 = vld [vmem:[#allocation87_spill] sm:$0xff] }
 0x7b6   : > { %3875 = vmatmul.mubr.msk.f32.vlgmr.msra.gmra.mrb[16].mxu0 %vm2803_vm2, %v3872_v2  ;;  %4541 = vmatpush1.bf16.msra.mxu1 %v5285_v63 }
 0x7b7   : > { %4543 = vmatprep.subr.bf16.mxu1 %v5291_v36  ;;  %v6268_v36 = vld [vmem:[#allocation72_spill] sm:$0xff] }
 0x7ba   : > { %4545 = vmatpush1.bf16.msra.mxu1 %v5295_v3  ;;  %v6258_v3 = vld [vmem:[#allocation61_spill] sm:$0xff] }
 0x7bb   : > { %4547 = vmatprep.subr.bf16.mxu1 %v6190_v43  ;;  %v6278_v43 = vld [vmem:[#allocation88_spill] sm:$0xff] }
 0x7be   : > { %4549 = vmatpush1.bf16.msra.mxu1 %v5303_v41  ;;  %v6267_v41 = vld [vmem:[#allocation70_spill] sm:$0xff] }
 0x7bf   : > { %4551 = vmatprep.subr.bf16.mxu1 %v6192_v24  ;;  %v6279_v24 = vld [vmem:[#allocation89_spill] sm:$0xff] }
 0x7c2   : > { %4553 = vmatpush1.bf16.msra.mxu1 %v5311_v7  ;;  %v6259_v7 = vld [vmem:[#allocation62_spill] sm:$0xff] }
 0x7c3   : > { %4555 = vmatprep.subr.bf16.mxu1 %v6194_v60  ;;  %v6280_v60 = vld [vmem:[#allocation90_spill] sm:$0xff] }
 0x7c6   : > { %4557 = vmatpush1.bf16.msra.mxu1 %v5319_v13  ;;  %v3653_v13 = vld [vmem:[%s5924_s8] sm:$0xf] }
 0x7c7   : > { %4559 = vmatprep.subr.bf16.mxu1 %v6196_v37  ;;  %3656 = vperm.xlu1 %4753, %v3653_v13   ;;  %v6282_v37 = vld [vmem:[#allocation92_spill] sm:$0xff] }
 0x7ca   : > { %4561 = vmatpush1.bf16.msra.mxu1 %v5327_v20 }
 0x7cb   : > { %4563 = vmatprep.subr.bf16.mxu1 %v6198_v50  ;;  %v3661_v50 = vld [vmem:[%s417_s11] sm:$0xff]  ;;  %s4796_s11 = sshll.u32 %s4865_s17, 4  ;;  %s4797_s11 = int_to_ptr.vmem [resolvable:$false] %s4796_s11 }
 0x7cc   : > { %s4798_s21 = scalar_lea.vmem %s4797_s11, 256  ;;  %p4799_p2 = scmp.lt.s32.totalorder %s5876_s29, %s4797_s11 }
 0x7cd   : > { %p4800_p3 = scmp.lt.s32.totalorder %s4798_s21, %s4792_s28 }
 0x7ce   : > { %4565 = vmatpush1.bf16.msra.mxu1 %v5335_v26 }
 0x7cf   : > { %4567 = vmatprep.subr.bf16.mxu1 %v6200_v8  ;;  %p4801_p4 = por %p4800_p3, %p4799_p2 }
 0x7d1   : > { %p4802_p7 = pnand %p4801_p4, %p4795_p12 }
 0x7d2   : > { %4569 = vmatpush1.bf16.msra.mxu1 %v5343_v32  ;;  %v6260_v32 = vld [vmem:[#allocation63_spill] sm:$0xff] }
 0x7d3   : > { %4571 = vmatprep.subr.bf16.mxu1 %v6202_v15 }
 0x7d6   : > { %4573 = vmatpush1.bf16.msra.mxu1 %v5351_v38  ;;  %v6261_v38 = vld [vmem:[#allocation64_spill] sm:$0xff] }
 0x7d7   : > { %4575 = vmatprep.subr.bf16.mxu1 %v5354_v11  ;;  %v6269_v11 = vld [vmem:[#allocation73_spill] sm:$0xff] }
 0x7da   : > { %4577 = vmatpush1.bf16.msra.mxu1 %v5359_v46  ;;  %v6262_v46 = vld [vmem:[#allocation65_spill] sm:$0xff] }
 0x7db   : > { %4579 = vmatprep.subr.bf16.mxu1 %v5362_v45  ;;  %v6270_v45 = vld [vmem:[#allocation74_spill] sm:$0xff] }
 0x7de   : > { %4581 = vmatpush1.bf16.msra.mxu1 %v5367_v55  ;;  %v6271_v55 = vld [vmem:[#allocation75_spill] sm:$0xff] }
 0x7df   : > { %4583 = vmatprep.subr.bf16.mxu1 %v5384_v28  ;;  %v6272_v28 = vld [vmem:[#allocation76_spill] sm:$0xff] }
 0x7e2   : > { %4585 = vmatpush1.bf16.msra.mxu1 %v6258_v3 }
 0x7e3   : > { %4587 = vmatprep.subr.bf16.mxu1 %v6259_v7 }
 0x846   : > { %v3657_v8 = vpop.permute.xlu1 %3656 }
 0x875   : > { %v3042_v20 = vpop.f32.mrb[14].mxu0 }
 0x876   : > { %v3044_v26 = vpop.f32.mrb[15].mxu0 }
 0x877   : > { %3343 = vmatprep.mubr.f32.mxu1 %v3044_v26 }
 0x878   : > { %3344 = vmatmul.mubr.f32.vlgmr.msra.gmra.mrb[12].mxu1 %v3042_v20 }
 0x879   : > { %4589 = vmatpush1.bf16.msra.mxu1 %v5400_v19 }
 0x87a   : > { %4591 = vmatprep.subr.bf16.mxu1 %v6260_v32 }
 0x87d   : > { %4593 = vmatpush1.bf16.msra.mxu1 %v6261_v38 }
 0x87e   : > { %4595 = vmatprep.subr.bf16.mxu1 %v6262_v46 }
 0x881   : > { %4597 = vmatpush1.bf16.msra.mxu1 %v6263_v6 }
 0x882   : > { %4599 = vmatprep.subr.bf16.mxu1 %v6264_v42 }
 0x885   : > { %4601 = vmatpush1.bf16.msra.mxu1 %v6265_v25 }
 0x886   : > { %4603 = vmatprep.subr.bf16.mxu1 %v6266_v23 }
 0x889   : > { %4605 = vmatpush1.bf16.msra.mxu1 %v6267_v41  ;;  %v3573_v63 = vpop.f32.mrb[16].mxu0 }
 0x88a   : > { %4607 = vmatprep.subr.bf16.mxu1 %v6224_v52  ;;  %v3575_v19 = vpop.f32.mrb[17].mxu0 }
 0x88b   : > { %3644 = vmatprep.mubr.f32.mxu1 %v3575_v19 }
 0x88d   : > { %4609 = vmatpush1.bf16.msra.mxu1 %v6268_v36 }
 0x88e   : > { %4611 = vmatprep.subr.bf16.mxu1 %v6269_v11 }
 0x891   : > { %4613 = vmatpush1.bf16.msra.mxu1 %v6270_v45 }
 0x892   : > { %4615 = vmatprep.subr.bf16.mxu1 %v6271_v55 }
 0x895   : > { %4617 = vmatpush1.bf16.msra.mxu1 %v6272_v28 }
 0x896   : > { %4619 = vmatprep.subr.bf16.mxu1 %v6230_v21  ;;  %v3663_v21 = vcombine.high %v3661_v50, %v3661_v50 }
 0x899   : > { %4621 = vmatpush1.bf16.msra.mxu1 %v6231_v27 }
 0x89a   : > { %4623 = vmatprep.subr.bf16.mxu1 %v6232_v47 }
 0x89d   : > { %4625 = vmatpush1.bf16.msra.mxu1 %v6233_v40  ;;  %v6281_v40 = vld [vmem:[#allocation91_spill] sm:$0xff] }
 0x89e   : > { %4627 = vmatprep.subr.bf16.mxu1 %v6234_v39 }
 0x8a1   : > { %4629 = vmatpush1.bf16.msra.mxu1 %v6235_v53 }
 0x8a2   : > { %4631 = vmatprep.subr.bf16.mxu1 %v6273_v56 }
 0x8a5   : > { %4633 = vmatpush1.bf16.msra.mxu1 %v6274_v29 }
 0x8a6   : > { %4635 = vmatprep.subr.bf16.mxu1 %v6275_v9 }
 0x8a9   : > { %4637 = vmatpush1.bf16.msra.mxu1 %v6276_v57 }
 0x8aa   : > { %4639 = vmatprep.subr.bf16.mxu1 %v6277_v51 }
 0x8ad   : > { %4641 = vmatpush1.bf16.msra.mxu1 %v6278_v43 }
 0x8ae   : > { %4643 = vmatprep.subr.bf16.mxu1 %v6279_v24 }
 0x8b1   : > { %4645 = vmatpush1.bf16.msra.mxu1 %v6280_v60 }
 0x8b2   : > { %4647 = vmatprep.subr.bf16.mxu1 %v6281_v40 }
 0x8b5   : > { %4649 = vmatpush1.bf16.msra.mxu1 %v6282_v37 }
 0x8b8   : > { %3645 = vmatmul.mubr.f32.vlgmr.msra.gmra.mrb[12].mxu1 %v3573_v63 }
 0x98b   : > { %v3646_v15 = vpop.f32.mrb[12].mxu1 }
 0x98c   : > { %v3659_v27 = vadd.f32 %v3657_v8, %v3646_v15  ;;  %v3648_v47 = vpop.f32.mrb[13].mxu1 }
 0x98d   : > { %v3660_v52 = vadd.f32 %v3657_v8, %v3648_v47 }
 0x98e   : > { %v3665_v53 = vadd.f32 %v3661_v50, %v3659_v27 }
 0x98f   : > { %v3666_v39 = vadd.f32 %v3663_v21, %v3660_v52 }
 0x990   : > { %v3667_v33 = vsub.f32 0.0, %v3665_v53 }
 0x991   : > { %v3668_v34 = vsub.f32 0.0, %v3666_v39 }
 0x992   : > { %v3669_v44 = vmul.f32 1.442695, %v3667_v33 }
 0x993   : > { %v3671_v48 = vmul.f32 1.442695, %v3668_v34 }
 0x994   : > { %4756 = vpow2.f32 %v3669_v44 }
 0x995   : > { %4758 = vpow2.f32 %v3671_v48 }
 0x99e   : > { %v4757_v61 = vpop.eup %4756 }
 0x99f   : > { %v4759_v54 = vpop.eup %4758  ;;  %v3673_v22 = vadd.f32 1.0, %v4757_v61 }
 0x9a0   : > { %v3674_v30 = vadd.f32 1.0, %v4759_v54 }
 0x9a1   : > { %4760 = vrcp.f32 %v3673_v22 }
 0x9a2   : > { %4762 = vrcp.f32 %v3674_v30 }
 0x9ab   : > { %v4761_v58 = vpop.eup %4760 }
 0x9ac   : > { %v4763_v59 = vpop.eup %4762 }
 0x9ad   : > { %v3681_v0 = vcombine.low %v4761_v58, %v4763_v59 }
 0x9af   : > { %3683 = vst [vmem:[%s400_s26] sm:$0xff] %v3681_v0 }
 0x9b0   : > { %4805 = shalt.err (!%p4802_p7)
}
 0x9b1   : > { %s4806_s25 = scalar_lea.hbm %s5874_s18, 128  ;;  %s4810_s30 = scalar_lea.hbm %s5926_s10, 256 }
 0x9b2   : > { %p4807_p8 = scmp.ne.s32.totalorder %s5874_s18, %s4806_s25  ;;  %p4811_p1 = scmp.lt.u32.totalorder %s5874_s18, %s5926_s10 }
 0x9b3   : > { %p4812_p0 = scmp.lt.u32.totalorder %s4810_s30, %s4806_s25  ;;  %p4814_p6 = scmp.lt.u32.totalorder %s4806_s25, %s5874_s18 }
 0x9b4   : > { %p4808_p11 = pnand %p4807_p8, %p6283_p9 }
 0x9b5   : > { %p4813_p5 = por %p4812_p0, %p4811_p1 }
 0x9b6   : > { %p4809_p13 = pneg %p4808_p11 }
 0x9b7   : > { %p4815_p10 = por %p4814_p6, %p4813_p5 }
 0x9b9   : > { %p4816_p12 = pnand %p4815_p10, %p4809_p13 }
 0x9bb   : > { %4819 = shalt.err (!%p4816_p12)
}
 0x9bc   : > { %4702 = dma.vmem_to_hbm [thread:$0]  (%p6283_p9), %s5876_s29, 128, %s5874_s18, %s3685_s27  }
 0x9bd PF: > { %p4714_p2 = scmp.ge.s32.totalorder %s4858_s16, 2  ;;  %s3711_s28 = sand.u32 1, %s4846_s13  }
 0x9be   : > { %p6284_p3 = scmp.ne.s32.totalorder %s6073_s24, 0  ;;  %s3712_s11 = scalar_lea.sflag [#allocation4], %s3711_s28 }
 0x9c0   : > { %p4709_p4 = pnand %p4714_p2, %p6284_p3 }
 0x9c2   : > { %4841 = dma.done.wait (!%p4709_p4), %s3712_s11, 128  }
 0x9c3   : > { %4843 = vsyncadd (!%p4709_p4), %s3712_s11, 4294967168  ;;  %p21_p7 = scmp.ge.s32.totalorder %s4946_s19, 4   ;;  %s6285_s13 = smov %s4850_s14 }
 0x9c4   : > { %s6286_s14 = smov %s4854_s15  ;;  %s6287_s15 = smov %s4957_s22 }
 0x9c5   : > { %s6288_s16 = smov %s4946_s19  ;;  %23 = sbr.rel (!%p21_p7) target bundleno = 4 (0x4), region = 133 }
 0x9cc   :  { %3717 = vsyncpa [#allocation3], 1 }
 0x9cd   :  { %3719 = vsyncpa [#allocation3 + $0x1], 1 }
 0x9ce   :  { %3720 = vsyncpa [#allocation4], 1 }
 0x9cf   :  { %3722 = vsyncpa [#allocation4 + $0x1], 1 }

</bundles_post_ra>
